<compile_context>
chip_gen: v5e
topology: v5e:2x2
jax: 0.10.0
libtpu: 0.0.40
codegen_flags: <defaults>
</compile_context>

<pallas_src>
from functools import partial

import numpy as np
import jax
import jax.numpy as jnp
from jax import lax
from jax.experimental import pallas as pl
from jax.experimental.pallas import tpu as pltpu

# ----------------------- static config (small, module-consistent shapes) ----
BATCH = 8           # small latent batch
BATCH_BIG = 260     # awkward batch size: exercises multi-step grid + tight padding
DIM_IN = 64         # latent dimension (dim_in)
HIDDEN = 512        # fixed by the module (nn.Linear(dim_in, 512), nn.Linear(512, 512))
DIM_OUT = 128       # decoder output dimension (dim_out); lane-dense


def _round_up(x, m):
    return ((x + m - 1) // m) * m


def _cdiv(a, b):
    return (a + b - 1) // b


def _choose_batch_tiling(b):
    """Pick (tile, padded_batch) with >=2 grid steps for B>8 and small padding slack."""
    b_al = _round_up(max(int(b), 1), 8)
    if b_al <= 8:
        return b_al, b_al                       # tiny batch: single tile
    tb_max = 1024                               # ~4.5 MB/step of activations at f32
    n_steps = max(2, _cdiv(b_al, tb_max))       # >=2 steps -> both v7x TCs get work
    tb = _round_up(_cdiv(b_al, n_steps), 8)     # sublane aligned, proportional to B
    if tb >= 256:                               # big tiles: keep MXU M-dim 128-aligned
        tb = _round_up(tb, 128)
    b_pad = _round_up(b_al, tb)
    return tb, b_pad


# ----------------------- Pallas kernel -----------------------
def _linear_t(x, w_ref, b_ref):
    # x: [tb, K];  w_ref: [N, K]  (PyTorch nn.Linear layout);  b_ref: [1, N] (f32)
    # Contract dim 1 of both operands == x @ W.T, handled natively by the MXU.
    y = lax.dot_general(
        x,
        w_ref[...],
        dimension_numbers=(((1,), (1,)), ((), ())),
        preferred_element_type=jnp.float32,
    )
    return y + b_ref[...]                       # f32 bias add on the VPU


def vae_decoder_kernel(z_ref, w0_ref, b0_ref, w1_ref, b1_ref, w2_ref, b2_ref, out_ref):
    # z_ref:  [TB, K0]   (one batch tile; K0 = dim_in padded to a multiple of 128)
    # w*_ref: PyTorch [out, in] layout (no transposes anywhere)
    # b*_ref: [1, out]   (always f32)
    h = _linear_t(z_ref[...], w0_ref, b0_ref)
    h = jnp.maximum(h, 0.0)

    h = _linear_t(h.astype(w1_ref.dtype), w1_ref, b1_ref)   # cast is a no-op on f32 path
    h = jnp.maximum(h, 0.0)

    out = _linear_t(h.astype(w2_ref.dtype), w2_ref, b2_ref)
    out_ref[...] = out.astype(out_ref.dtype)


# ----------------------- wrapper -----------------------
@partial(jax.jit, static_argnames=("use_bf16",))
def vae_decoder(z, w0, b0, w1, b1, w2, b2, use_bf16=False):
    """Matches torch: relu(z @ w0.T + b0) -> relu(@ w1.T + b1) -> @ w2.T + b2.

    Weights stay in PyTorch nn.Linear layout ([out_features, in_features]); the kernel
    contracts against dim 1 directly, so no transposes (and no extra HBM traffic).
    """
    b, d_in = z.shape
    h0 = w0.shape[0]
    h1 = w1.shape[0]
    d_out = w2.shape[0]

    # ---- K padding: full 128-lane K edge for the first contraction (zeros are inert)
    d_in_p = _round_up(d_in, 128)
    if d_in_p != d_in:
        z = jnp.pad(z, ((0, 0), (0, d_in_p - d_in)))
        w0 = jnp.pad(w0, ((0, 0), (0, d_in_p - d_in)))

    # ---- optional bf16 MXU operands (f32 accumulation; biases/epilogue stay f32)
    if use_bf16:
        z = z.astype(jnp.bfloat16)
        w0 = w0.astype(jnp.bfloat16)
        w1 = w1.astype(jnp.bfloat16)
        w2 = w2.astype(jnp.bfloat16)

    b0r = b0.astype(jnp.float32).reshape(1, h0)
    b1r = b1.astype(jnp.float32).reshape(1, h1)
    b2r = b2.astype(jnp.float32).reshape(1, d_out)

    # ---- batch tiling (>=2 steps when B>8 so v7x megacore shards; tight padding)
    tb, b_pad = _choose_batch_tiling(b)
    if b_pad != b:
        z = jnp.pad(z, ((0, b_pad - b), (0, 0)))
    grid = (b_pad // tb,)

    out = pl.pallas_call(
        vae_decoder_kernel,
        out_shape=jax.ShapeDtypeStruct((b_pad, d_out), jnp.float32),
        grid=grid,
        in_specs=[
            pl.BlockSpec((tb, d_in_p), lambda i: (i, 0)),     # z tile marches with grid
            pl.BlockSpec((h0, d_in_p), lambda i: (0, 0)),     # weights: VMEM-resident
            pl.BlockSpec((1, h0),      lambda i: (0, 0)),
            pl.BlockSpec((h1, h0),     lambda i: (0, 0)),
            pl.BlockSpec((1, h1),      lambda i: (0, 0)),
            pl.BlockSpec((d_out, h1),  lambda i: (0, 0)),
            pl.BlockSpec((1, d_out),   lambda i: (0, 0)),
        ],
        out_specs=pl.BlockSpec((tb, d_out), lambda i: (i, 0)),
        compiler_params=pltpu.CompilerParams(
            dimension_semantics=("parallel",),
            # explicit limit so large tiles also compile under v5e's 16 MiB default
            vmem_limit_bytes=32 * 1024 * 1024,
        ),
    )(z, w0, b0r, w1, b1r, w2, b2r)

    return out[:b]


# ----------------------- pure-JAX reference (for correctness check) ---------
def ref_vae_decoder(z, w0, b0, w1, b1, w2, b2):
    h = jnp.maximum(z @ w0.T + b0, 0.0)
    h = jnp.maximum(h @ w1.T + b1, 0.0)
    return h @ w2.T + b2


# ----------------------- main -----------------------
if __name__ == "__main__":
    key = jax.random.PRNGKey(0)
    kz, k0, kb0, k1, kb1, k2, kb2, kz2 = jax.random.split(key, 8)

    # deterministic example inputs (PyTorch nn.Linear weight layout: [out, in])
    z = jax.random.normal(kz, (BATCH, DIM_IN), dtype=jnp.float32)
    w0 = 0.05 * jax.random.normal(k0, (HIDDEN, DIM_IN), dtype=jnp.float32)
    b0 = 0.05 * jax.random.normal(kb0, (HIDDEN,), dtype=jnp.float32)
    w1 = 0.05 * jax.random.normal(k1, (HIDDEN, HIDDEN), dtype=jnp.float32)
    b1 = 0.05 * jax.random.normal(kb1, (HIDDEN,), dtype=jnp.float32)
    w2 = 0.05 * jax.random.normal(k2, (DIM_OUT, HIDDEN), dtype=jnp.float32)
    b2 = 0.05 * jax.random.normal(kb2, (DIM_OUT,), dtype=jnp.float32)

    # --- f32 path, small batch (single tile) ---
    out_kernel = jax.block_until_ready(vae_decoder(z, w0, b0, w1, b1, w2, b2))
    out_ref = jax.block_until_ready(ref_vae_decoder(z, w0, b0, w1, b1, w2, b2))
    if not np.allclose(np.asarray(out_kernel), np.asarray(out_ref), atol=1e-4, rtol=1e-4):
        err = float(np.max(np.abs(np.asarray(out_kernel) - np.asarray(out_ref))))
        raise SystemExit("f32 kernel mismatch vs reference, max abs err = %e" % err)

    # --- f32 path, awkward batch (multi-step 'parallel' grid + tight padding) ---
    z_big = jax.random.normal(kz2, (BATCH_BIG, DIM_IN), dtype=jnp.float32)
    out_big = jax.block_until_ready(vae_decoder(z_big, w0, b0, w1, b1, w2, b2))
    ref_big = jax.block_until_ready(ref_vae_decoder(z_big, w0, b0, w1, b1, w2, b2))
    if not np.allclose(np.asarray(out_big), np.asarray(ref_big), atol=1e-4, rtol=1e-4):
        err = float(np.max(np.abs(np.asarray(out_big) - np.asarray(ref_big))))
        raise SystemExit("f32 kernel (big batch) mismatch, max abs err = %e" % err)

    # --- bf16-MXU path (perf flag): f32 accumulation, looser tolerance ---
    out_bf16 = jax.block_until_ready(
        vae_decoder(z, w0, b0, w1, b1, w2, b2, use_bf16=True))
    if not np.allclose(np.asarray(out_bf16), np.asarray(out_ref), atol=5e-2, rtol=5e-2):
        err = float(np.max(np.abs(np.asarray(out_bf16) - np.asarray(out_ref))))
        raise SystemExit("bf16 kernel mismatch vs f32 reference, max abs err = %e" % err)

    print("KERNEL_OK")
</pallas_src>

<mosaic_0001>
module attributes {stable_mosaic.version = 11 : i64} {
  func.func @vae_decoder_kernel(%arg0: i32, %arg1: memref<8x128xf32, #tpu.memory_space<vmem>>, %arg2: memref<512x128xf32, #tpu.memory_space<vmem>>, %arg3: memref<1x512xf32, #tpu.memory_space<vmem>>, %arg4: memref<512x512xf32, #tpu.memory_space<vmem>>, %arg5: memref<1x512xf32, #tpu.memory_space<vmem>>, %arg6: memref<128x512xf32, #tpu.memory_space<vmem>>, %arg7: memref<1x128xf32, #tpu.memory_space<vmem>>, %arg8: memref<8x128xf32, #tpu.memory_space<vmem>>) attributes {dimension_semantics = [#tpu.dimension_semantics<parallel>], iteration_bounds = array<i64: 1>, scalar_prefetch = 0 : i64, scratch_operands = 0 : i64, tpu.core_type = #tpu.core_type<tc>, window_params = [{transform_indices = @transform_0, window_bounds = array<i64: 8, 128>}, {pipeline_mode = #tpu.pipeline_mode<synchronous>, transform_indices = @transform_1, window_bounds = array<i64: 512, 128>}, {pipeline_mode = #tpu.pipeline_mode<synchronous>, transform_indices = @transform_2, window_bounds = array<i64: 1, 512>}, {pipeline_mode = #tpu.pipeline_mode<synchronous>, transform_indices = @transform_3, window_bounds = array<i64: 512, 512>}, {pipeline_mode = #tpu.pipeline_mode<synchronous>, transform_indices = @transform_4, window_bounds = array<i64: 1, 512>}, {pipeline_mode = #tpu.pipeline_mode<synchronous>, transform_indices = @transform_5, window_bounds = array<i64: 128, 512>}, {pipeline_mode = #tpu.pipeline_mode<synchronous>, transform_indices = @transform_6, window_bounds = array<i64: 1, 128>}, {transform_indices = @transform_7, window_bounds = array<i64: 8, 128>}]} {
    %c0 = arith.constant 0 : index
    %c0_0 = arith.constant 0 : index
    %0 = vector.load %arg1[%c0, %c0_0] : memref<8x128xf32, #tpu.memory_space<vmem>>, vector<8x128xf32>
    %c0_1 = arith.constant 0 : index
    %c0_2 = arith.constant 0 : index
    %1 = vector.load %arg2[%c0_1, %c0_2] : memref<512x128xf32, #tpu.memory_space<vmem>>, vector<512x128xf32>
    %cst = arith.constant dense<0.000000e+00> : vector<8x512xf32>
    %2 = tpu.matmul %0, %1, %cst {dimension_numbers = #tpu.dot_dimension_numbers<[1], [1], [0], [0], [0, 0, 1, 0], [], []>} : vector<8x128xf32>, vector<512x128xf32>, vector<8x512xf32> -> vector<8x512xf32>
    %c0_3 = arith.constant 0 : index
    %c0_4 = arith.constant 0 : index
    %3 = vector.load %arg3[%c0_3, %c0_4] : memref<1x512xf32, #tpu.memory_space<vmem>>, vector<1x512xf32>
    %4 = vector.broadcast %3 : vector<1x512xf32> to vector<8x512xf32>
    %5 = arith.addf %2, %4 : vector<8x512xf32>
    %cst_5 = arith.constant 0.000000e+00 : f32
    %6 = vector.broadcast %cst_5 : f32 to vector<8x512xf32>
    %7 = arith.maximumf %5, %6 : vector<8x512xf32>
    %c0_6 = arith.constant 0 : index
    %c0_7 = arith.constant 0 : index
    %8 = vector.load %arg4[%c0_6, %c0_7] : memref<512x512xf32, #tpu.memory_space<vmem>>, vector<512x512xf32>
    %cst_8 = arith.constant dense<0.000000e+00> : vector<8x512xf32>
    %9 = tpu.matmul %7, %8, %cst_8 {dimension_numbers = #tpu.dot_dimension_numbers<[1], [1], [0], [0], [0, 0, 1, 0], [], []>} : vector<8x512xf32>, vector<512x512xf32>, vector<8x512xf32> -> vector<8x512xf32>
    %c0_9 = arith.constant 0 : index
    %c0_10 = arith.constant 0 : index
    %10 = vector.load %arg5[%c0_9, %c0_10] : memref<1x512xf32, #tpu.memory_space<vmem>>, vector<1x512xf32>
    %11 = vector.broadcast %10 : vector<1x512xf32> to vector<8x512xf32>
    %12 = arith.addf %9, %11 : vector<8x512xf32>
    %cst_11 = arith.constant 0.000000e+00 : f32
    %13 = vector.broadcast %cst_11 : f32 to vector<8x512xf32>
    %14 = arith.maximumf %12, %13 : vector<8x512xf32>
    %c0_12 = arith.constant 0 : index
    %c0_13 = arith.constant 0 : index
    %15 = vector.load %arg6[%c0_12, %c0_13] : memref<128x512xf32, #tpu.memory_space<vmem>>, vector<128x512xf32>
    %cst_14 = arith.constant dense<0.000000e+00> : vector<8x128xf32>
    %16 = tpu.matmul %14, %15, %cst_14 {dimension_numbers = #tpu.dot_dimension_numbers<[1], [1], [0], [0], [0, 0, 1, 0], [], []>} : vector<8x512xf32>, vector<128x512xf32>, vector<8x128xf32> -> vector<8x128xf32>
    %c0_15 = arith.constant 0 : index
    %c0_16 = arith.constant 0 : index
    %17 = vector.load %arg7[%c0_15, %c0_16] : memref<1x128xf32, #tpu.memory_space<vmem>>, vector<1x128xf32>
    %18 = vector.broadcast %17 : vector<1x128xf32> to vector<8x128xf32>
    %19 = arith.addf %16, %18 : vector<8x128xf32>
    %c0_17 = arith.constant 0 : index
    %c0_18 = arith.constant 0 : index
    %20 = vector.load %arg8[%c0_17, %c0_18] : memref<8x128xf32, #tpu.memory_space<vmem>>, vector<8x128xf32>
    tpu.vector_store %arg8[%c0_17, %c0_18], %19 {strides = array<i32>} : memref<8x128xf32, #tpu.memory_space<vmem>>, vector<8x128xf32>,
    return
  }
  func.func @transform_0(%arg0: i32) -> (i32, i32) {
    %c0_i32 = arith.constant 0 : i32
    %c0_i32_0 = arith.constant 0 : i32
    return %arg0, %c0_i32 : i32, i32
  }
  func.func @transform_1(%arg0: i32) -> (i32, i32) {
    %c0_i32 = arith.constant 0 : i32
    %c0_i32_0 = arith.constant 0 : i32
    %c0_i32_1 = arith.constant 0 : i32
    return %c0_i32, %c0_i32_0 : i32, i32
  }
  func.func @transform_2(%arg0: i32) -> (i32, i32) {
    %c0_i32 = arith.constant 0 : i32
    %c0_i32_0 = arith.constant 0 : i32
    %c0_i32_1 = arith.constant 0 : i32
    return %c0_i32, %c0_i32_0 : i32, i32
  }
  func.func @transform_3(%arg0: i32) -> (i32, i32) {
    %c0_i32 = arith.constant 0 : i32
    %c0_i32_0 = arith.constant 0 : i32
    %c0_i32_1 = arith.constant 0 : i32
    return %c0_i32, %c0_i32_0 : i32, i32
  }
  func.func @transform_4(%arg0: i32) -> (i32, i32) {
    %c0_i32 = arith.constant 0 : i32
    %c0_i32_0 = arith.constant 0 : i32
    %c0_i32_1 = arith.constant 0 : i32
    return %c0_i32, %c0_i32_0 : i32, i32
  }
  func.func @transform_5(%arg0: i32) -> (i32, i32) {
    %c0_i32 = arith.constant 0 : i32
    %c0_i32_0 = arith.constant 0 : i32
    %c0_i32_1 = arith.constant 0 : i32
    return %c0_i32, %c0_i32_0 : i32, i32
  }
  func.func @transform_6(%arg0: i32) -> (i32, i32) {
    %c0_i32 = arith.constant 0 : i32
    %c0_i32_0 = arith.constant 0 : i32
    %c0_i32_1 = arith.constant 0 : i32
    return %c0_i32, %c0_i32_0 : i32, i32
  }
  func.func @transform_7(%arg0: i32) -> (i32, i32) {
    %c0_i32 = arith.constant 0 : i32
    %c0_i32_0 = arith.constant 0 : i32
    return %arg0, %c0_i32 : i32, i32
  }
}

</mosaic_0001>

<bundles_post_ra>
// kernel: vae_decoder.1
= control target key start
LH: loop header
LB: loop body
LE: loop exit
PB: predicated region body
PF: predicated region fallthrough
CT: control target
= control target key end

     0   :  { %12 = vsyncpa [#allocation3], 0  ;;  %s1491_s0 = inlined_call_operand.vmem [shape: f32[8,128], index: 0, kind: input, shape index: {}]   ;;  %s1492_s1 = inlined_call_operand.vmem [shape: f32[512,128], index: 1, kind: input, shape index: {}]   ;;  %s1493_s2 = inlined_call_operand.vmem [shape: f32[1,512], index: 2, kind: input, shape index: {}]   ;;  %s1494_s3 = inlined_call_operand.hbm [shape: f32[512,512], index: 3, kind: input, shape index: {}]   ;;  %s1495_s4 = inlined_call_operand.vmem [shape: f32[1,512], index: 4, kind: input, shape index: {}]   ;;  %s1496_s5 = inlined_call_operand.vmem [shape: f32[128,512], index: 5, kind: input, shape index: {}]   ;;  %s1497_s6 = inlined_call_operand.vmem [shape: f32[1,128], index: 6, kind: input, shape index: {}]   ;;  %s1498_s7 = inlined_call_operand.hbm [shape: f32[8,128], index: 7, kind: output, shape index: {}]  }
   0x1   :  { %13 = vsyncpa [#allocation4], 0  ;;  %s24_s26 = sshll.u32 %s1494_s3, 4  ;;  %s1015_s27 = smov [#allocation2]   ;;  %s25_s26 = int_to_ptr.hbm [resolvable:$true] %s24_s26 }
   0x2   :  { %s26_s28 = sshll.u32 %s1015_s27, 4  ;;  %s1016_s29 = smov 512   ;;  %s27_s28 = int_to_ptr.vmem [resolvable:$true] %s26_s28 }
   0x3   :  { %s1017_s30 = smov 32  }
   0x4   :  { %32 = dma.hbm_to_vmem [thread:$0]  %s25_s26, 32768, %s27_s28, [#allocation3], %s1016_s29, %s1016_s29, %s1017_s30  }
   0x5   :  { %1011 = dma.done.wait [#allocation3], 32768  }
   0x6   :  { %1012 = vsyncadd [#allocation3], 4294934528  ;;  %v59_v0 = vld [vmem:[%s1492_s1 + $0x78] sm:$0xff]  ;;  %v58_v4 = vld [vmem:[%s1492_s1 + $0x70] sm:$0xff]  ;;  %s948_s16 = sshll.u32 %s1498_s7, 4  ;;  %s949_s16 = int_to_ptr.hbm [resolvable:$true] %s948_s16 }
   0x7   :  { %v75_v1 = vld [vmem:[%s1492_s1 + $0xf8] sm:$0xff]  ;;  %118 = vmatpush.xpose.msra.mxu0 %v59_v0  ;;  %v74_v5 = vld [vmem:[%s1492_s1 + $0xf0] sm:$0xff]  ;;  %v57_v8 = vld [vmem:[%s1492_s1 + $0x68] sm:$0xff] }
   0x8   :  { %v91_v2 = vld [vmem:[%s1492_s1 + $0x178] sm:$0xff]  ;;  %138 = vmatpush.xpose.msra.mxu1 %v75_v1  ;;  %v90_v6 = vld [vmem:[%s1492_s1 + $0x170] sm:$0xff]  ;;  %v73_v9 = vld [vmem:[%s1492_s1 + $0xe8] sm:$0xff] }
   0x9   :  { %v107_v3 = vld [vmem:[%s1492_s1 + $0x1f8] sm:$0xff]  ;;  %158 = vmatpush.xpose.msra.mxu2 %v91_v2  ;;  %v106_v7 = vld [vmem:[%s1492_s1 + $0x1f0] sm:$0xff]  ;;  %v89_v10 = vld [vmem:[%s1492_s1 + $0x168] sm:$0xff] }
   0xa   :  { %178 = vmatpush.xpose.msra.mxu3 %v107_v3  ;;  %v105_v11 = vld [vmem:[%s1492_s1 + $0x1e8] sm:$0xff]  ;;  %v56_v12 = vld [vmem:[%s1492_s1 + $0x60] sm:$0xff]  ;;  %v55_v16 = vld [vmem:[%s1492_s1 + $0x58] sm:$0xff] }
   0xb   :  { %119 = vmatpush.xpose.msra.mxu0 %v58_v4  ;;  %v72_v13 = vld [vmem:[%s1492_s1 + $0xe0] sm:$0xff]  ;;  %v71_v17 = vld [vmem:[%s1492_s1 + $0xd8] sm:$0xff]  ;;  %v54_v20 = vld [vmem:[%s1492_s1 + $0x50] sm:$0xff] }
   0xc   :  { %139 = vmatpush.xpose.msra.mxu1 %v74_v5  ;;  %v88_v14 = vld [vmem:[%s1492_s1 + $0x160] sm:$0xff]  ;;  %v87_v18 = vld [vmem:[%s1492_s1 + $0x158] sm:$0xff]  ;;  %v70_v21 = vld [vmem:[%s1492_s1 + $0xd0] sm:$0xff] }
   0xd   :  { %159 = vmatpush.xpose.msra.mxu2 %v90_v6  ;;  %v104_v15 = vld [vmem:[%s1492_s1 + $0x1e0] sm:$0xff]  ;;  %v103_v19 = vld [vmem:[%s1492_s1 + $0x1d8] sm:$0xff]  ;;  %v86_v22 = vld [vmem:[%s1492_s1 + $0x150] sm:$0xff] }
   0xe   :  { %179 = vmatpush.xpose.msra.mxu3 %v106_v7  ;;  %v102_v23 = vld [vmem:[%s1492_s1 + $0x1d0] sm:$0xff]  ;;  %v53_v24 = vld [vmem:[%s1492_s1 + $0x48] sm:$0xff]  ;;  %v52_v28 = vld [vmem:[%s1492_s1 + $0x40] sm:$0xff] }
   0xf   :  { %120 = vmatpush.xpose.msra.mxu0 %v57_v8  ;;  %v69_v25 = vld [vmem:[%s1492_s1 + $0xc8] sm:$0xff]  ;;  %v68_v29 = vld [vmem:[%s1492_s1 + $0xc0] sm:$0xff]  ;;  %v51_v32 = vld [vmem:[%s1492_s1 + $0x38] sm:$0xff] }
  0x10   :  { %140 = vmatpush.xpose.msra.mxu1 %v73_v9  ;;  %v85_v26 = vld [vmem:[%s1492_s1 + $0x148] sm:$0xff]  ;;  %v84_v30 = vld [vmem:[%s1492_s1 + $0x140] sm:$0xff]  ;;  %v67_v33 = vld [vmem:[%s1492_s1 + $0xb8] sm:$0xff] }
  0x11   :  { %160 = vmatpush.xpose.msra.mxu2 %v89_v10  ;;  %v101_v27 = vld [vmem:[%s1492_s1 + $0x1c8] sm:$0xff]  ;;  %v100_v31 = vld [vmem:[%s1492_s1 + $0x1c0] sm:$0xff]  ;;  %v83_v34 = vld [vmem:[%s1492_s1 + $0x138] sm:$0xff] }
  0x12   :  { %180 = vmatpush.xpose.msra.mxu3 %v105_v11  ;;  %v99_v35 = vld [vmem:[%s1492_s1 + $0x1b8] sm:$0xff]  ;;  %v50_v36 = vld [vmem:[%s1492_s1 + $0x30] sm:$0xff]  ;;  %v49_v40 = vld [vmem:[%s1492_s1 + $0x28] sm:$0xff] }
  0x13   :  { %121 = vmatpush.xpose.msra.mxu0 %v56_v12  ;;  %v66_v37 = vld [vmem:[%s1492_s1 + $0xb0] sm:$0xff]  ;;  %v65_v41 = vld [vmem:[%s1492_s1 + $0xa8] sm:$0xff]  ;;  %v48_v44 = vld [vmem:[%s1492_s1 + $0x20] sm:$0xff] }
  0x14   :  { %141 = vmatpush.xpose.msra.mxu1 %v72_v13  ;;  %v82_v38 = vld [vmem:[%s1492_s1 + $0x130] sm:$0xff]  ;;  %v81_v42 = vld [vmem:[%s1492_s1 + $0x128] sm:$0xff]  ;;  %v64_v45 = vld [vmem:[%s1492_s1 + $0xa0] sm:$0xff] }
  0x15   :  { %161 = vmatpush.xpose.msra.mxu2 %v88_v14  ;;  %v98_v39 = vld [vmem:[%s1492_s1 + $0x1b0] sm:$0xff]  ;;  %v97_v43 = vld [vmem:[%s1492_s1 + $0x1a8] sm:$0xff]  ;;  %v80_v46 = vld [vmem:[%s1492_s1 + $0x120] sm:$0xff] }
  0x16   :  { %181 = vmatpush.xpose.msra.mxu3 %v104_v15  ;;  %v96_v47 = vld [vmem:[%s1492_s1 + $0x1a0] sm:$0xff]  ;;  %v47_v48 = vld [vmem:[%s1492_s1 + $0x18] sm:$0xff]  ;;  %v46_v52 = vld [vmem:[%s1492_s1 + $0x10] sm:$0xff] }
  0x17   :  { %122 = vmatpush.xpose.msra.mxu0 %v55_v16  ;;  %v63_v49 = vld [vmem:[%s1492_s1 + $0x98] sm:$0xff]  ;;  %v62_v53 = vld [vmem:[%s1492_s1 + $0x90] sm:$0xff]  ;;  %v45_v56 = vld [vmem:[%s1492_s1 + $0x8] sm:$0xff] }
  0x18   :  { %142 = vmatpush.xpose.msra.mxu1 %v71_v17  ;;  %v79_v50 = vld [vmem:[%s1492_s1 + $0x118] sm:$0xff]  ;;  %v78_v54 = vld [vmem:[%s1492_s1 + $0x110] sm:$0xff]  ;;  %v61_v57 = vld [vmem:[%s1492_s1 + $0x88] sm:$0xff] }
  0x19   :  { %162 = vmatpush.xpose.msra.mxu2 %v87_v18  ;;  %v95_v51 = vld [vmem:[%s1492_s1 + $0x198] sm:$0xff]  ;;  %v94_v55 = vld [vmem:[%s1492_s1 + $0x190] sm:$0xff]  ;;  %v77_v58 = vld [vmem:[%s1492_s1 + $0x108] sm:$0xff] }
  0x1a   :  { %182 = vmatpush.xpose.msra.mxu3 %v103_v19  ;;  %v93_v59 = vld [vmem:[%s1492_s1 + $0x188] sm:$0xff]  ;;  %v44_v60 = vld [vmem:[%s1492_s1] sm:$0xff]  ;;  %v264_v3 = vld [vmem:[#allocation2 + $0x1f0] sm:$0xff] }
  0x1b   :  { %123 = vmatpush.xpose.msra.mxu0 %v54_v20  ;;  %v60_v61 = vld [vmem:[%s1492_s1 + $0x80] sm:$0xff]  ;;  %v263_v1 = vld [vmem:[#allocation2 + $0x1e8] sm:$0xff]  ;;  %v265_v4 = vld [vmem:[#allocation2 + $0x1f8] sm:$0xff] }
  0x1c   :  { %143 = vmatpush.xpose.msra.mxu1 %v70_v21  ;;  %v76_v62 = vld [vmem:[%s1492_s1 + $0x100] sm:$0xff]  ;;  %v259_v6 = vld [vmem:[#allocation2 + $0x1c8] sm:$0xff]  ;;  %v260_v7 = vld [vmem:[#allocation2 + $0x1d0] sm:$0xff] }
  0x1d   :  { %163 = vmatpush.xpose.msra.mxu2 %v86_v22  ;;  %v92_v63 = vld [vmem:[%s1492_s1 + $0x180] sm:$0xff]  ;;  %v261_v8 = vld [vmem:[#allocation2 + $0x1d8] sm:$0xff]  ;;  %v255_v10 = vld [vmem:[#allocation2 + $0x1a8] sm:$0xff] }
  0x1e   :  { %183 = vmatpush.xpose.msra.mxu3 %v102_v23  ;;  %v262_v0 = vld [vmem:[#allocation2 + $0x1e0] sm:$0xff]  ;;  %v256_v11 = vld [vmem:[#allocation2 + $0x1b0] sm:$0xff]  ;;  %v257_v12 = vld [vmem:[#allocation2 + $0x1b8] sm:$0xff] }
  0x1f   :  { %124 = vmatpush.xpose.msra.mxu0 %v53_v24  ;;  %v43_v2 = vld [vmem:[%s1491_s0] sm:$0xff]  ;;  %v251_v14 = vld [vmem:[#allocation2 + $0x188] sm:$0xff]  ;;  %v252_v15 = vld [vmem:[#allocation2 + $0x190] sm:$0xff] }
  0x20   :  { %144 = vmatpush.xpose.msra.mxu1 %v69_v25  ;;  %v258_v5 = vld [vmem:[#allocation2 + $0x1c0] sm:$0xff]  ;;  %v253_v16 = vld [vmem:[#allocation2 + $0x198] sm:$0xff]  ;;  %v247_v18 = vld [vmem:[#allocation2 + $0x168] sm:$0xff] }
  0x21   :  { %164 = vmatpush.xpose.msra.mxu2 %v85_v26  ;;  %v254_v9 = vld [vmem:[#allocation2 + $0x1a0] sm:$0xff]  ;;  %v248_v19 = vld [vmem:[#allocation2 + $0x170] sm:$0xff]  ;;  %v249_v20 = vld [vmem:[#allocation2 + $0x178] sm:$0xff] }
  0x22   :  { %184 = vmatpush.xpose.msra.mxu3 %v101_v27  ;;  %v250_v13 = vld [vmem:[#allocation2 + $0x180] sm:$0xff]  ;;  %v243_v22 = vld [vmem:[#allocation2 + $0x148] sm:$0xff]  ;;  %v244_v23 = vld [vmem:[#allocation2 + $0x150] sm:$0xff] }
  0x23   :  { %125 = vmatpush.xpose.msra.mxu0 %v52_v28  ;;  %v246_v17 = vld [vmem:[#allocation2 + $0x160] sm:$0xff]  ;;  %v245_v24 = vld [vmem:[#allocation2 + $0x158] sm:$0xff]  ;;  %v239_v26 = vld [vmem:[#allocation2 + $0x128] sm:$0xff] }
  0x24   :  { %145 = vmatpush.xpose.msra.mxu1 %v68_v29  ;;  %v242_v21 = vld [vmem:[#allocation2 + $0x140] sm:$0xff]  ;;  %v240_v27 = vld [vmem:[#allocation2 + $0x130] sm:$0xff]  ;;  %v241_v28 = vld [vmem:[#allocation2 + $0x138] sm:$0xff] }
  0x25   :  { %165 = vmatpush.xpose.msra.mxu2 %v84_v30  ;;  %v238_v25 = vld [vmem:[#allocation2 + $0x120] sm:$0xff]  ;;  %v235_v30 = vld [vmem:[#allocation2 + $0x108] sm:$0xff] }
  0x26   :  { %185 = vmatpush.xpose.msra.mxu3 %v100_v31  ;;  %v234_v29 = vld [vmem:[#allocation2 + $0x100] sm:$0xff]  ;;  %v236_v31 = vld [vmem:[#allocation2 + $0x110] sm:$0xff] }
  0x27   :  { %126 = vmatpush.xpose.msra.mxu0 %v51_v32  ;;  %v237_v32 = vld [vmem:[#allocation2 + $0x118] sm:$0xff] }
  0x28   :  { %146 = vmatpush.xpose.msra.mxu1 %v67_v33  ;;  %v230_v33 = vld [vmem:[#allocation2 + $0xe0] sm:$0xff] }
  0x29   :  { %166 = vmatpush.xpose.msra.mxu2 %v83_v34  ;;  %v231_v34 = vld [vmem:[#allocation2 + $0xe8] sm:$0xff] }
  0x2a   :  { %186 = vmatpush.xpose.msra.mxu3 %v99_v35  ;;  %v232_v35 = vld [vmem:[#allocation2 + $0xf0] sm:$0xff] }
  0x2b   :  { %127 = vmatpush.xpose.msra.mxu0 %v50_v36  ;;  %v233_v36 = vld [vmem:[#allocation2 + $0xf8] sm:$0xff] }
  0x2c   :  { %147 = vmatpush.xpose.msra.mxu1 %v66_v37  ;;  %v226_v37 = vld [vmem:[#allocation2 + $0xc0] sm:$0xff] }
  0x2d   :  { %167 = vmatpush.xpose.msra.mxu2 %v82_v38  ;;  %v227_v38 = vld [vmem:[#allocation2 + $0xc8] sm:$0xff] }
  0x2e   :  { %187 = vmatpush.xpose.msra.mxu3 %v98_v39  ;;  %v228_v39 = vld [vmem:[#allocation2 + $0xd0] sm:$0xff] }
  0x2f   :  { %128 = vmatpush.xpose.msra.mxu0 %v49_v40  ;;  %v229_v40 = vld [vmem:[#allocation2 + $0xd8] sm:$0xff] }
  0x30   :  { %148 = vmatpush.xpose.msra.mxu1 %v65_v41  ;;  %v222_v41 = vld [vmem:[#allocation2 + $0xa0] sm:$0xff] }
  0x31   :  { %168 = vmatpush.xpose.msra.mxu2 %v81_v42  ;;  %v223_v42 = vld [vmem:[#allocation2 + $0xa8] sm:$0xff] }
  0x32   :  { %188 = vmatpush.xpose.msra.mxu3 %v97_v43  ;;  %v224_v43 = vld [vmem:[#allocation2 + $0xb0] sm:$0xff] }
  0x33   :  { %129 = vmatpush.xpose.msra.mxu0 %v48_v44  ;;  %v225_v44 = vld [vmem:[#allocation2 + $0xb8] sm:$0xff] }
  0x34   :  { %149 = vmatpush.xpose.msra.mxu1 %v64_v45  ;;  %v218_v45 = vld [vmem:[#allocation2 + $0x80] sm:$0xff] }
  0x35   :  { %169 = vmatpush.xpose.msra.mxu2 %v80_v46  ;;  %v219_v46 = vld [vmem:[#allocation2 + $0x88] sm:$0xff] }
  0x36   :  { %189 = vmatpush.xpose.msra.mxu3 %v96_v47  ;;  %v220_v47 = vld [vmem:[#allocation2 + $0x90] sm:$0xff] }
  0x37   :  { %130 = vmatpush.xpose.msra.mxu0 %v47_v48  ;;  %v221_v48 = vld [vmem:[#allocation2 + $0x98] sm:$0xff] }
  0x38   :  { %150 = vmatpush.xpose.msra.mxu1 %v63_v49  ;;  %v214_v49 = vld [vmem:[#allocation2 + $0x60] sm:$0xff] }
  0x39   :  { %170 = vmatpush.xpose.msra.mxu2 %v79_v50  ;;  %v215_v50 = vld [vmem:[#allocation2 + $0x68] sm:$0xff] }
  0x3a   :  { %190 = vmatpush.xpose.msra.mxu3 %v95_v51  ;;  %v216_v51 = vld [vmem:[#allocation2 + $0x70] sm:$0xff] }
  0x3b   :  { %131 = vmatpush.xpose.msra.mxu0 %v46_v52  ;;  %v217_v52 = vld [vmem:[#allocation2 + $0x78] sm:$0xff] }
  0x3c   :  { %151 = vmatpush.xpose.msra.mxu1 %v62_v53  ;;  %v210_v53 = vld [vmem:[#allocation2 + $0x40] sm:$0xff] }
  0x3d   :  { %171 = vmatpush.xpose.msra.mxu2 %v78_v54  ;;  %v211_v54 = vld [vmem:[#allocation2 + $0x48] sm:$0xff] }
  0x3e   :  { %191 = vmatpush.xpose.msra.mxu3 %v94_v55  ;;  %v212_v55 = vld [vmem:[#allocation2 + $0x50] sm:$0xff] }
  0x3f   :  { %132 = vmatpush.xpose.msra.mxu0 %v45_v56  ;;  %v213_v56 = vld [vmem:[#allocation2 + $0x58] sm:$0xff] }
  0x40   :  { %152 = vmatpush.xpose.msra.mxu1 %v61_v57  ;;  %v206_v57 = vld [vmem:[#allocation2 + $0x20] sm:$0xff] }
  0x41   :  { %172 = vmatpush.xpose.msra.mxu2 %v77_v58  ;;  %v207_v58 = vld [vmem:[#allocation2 + $0x28] sm:$0xff] }
  0x42   :  { %192 = vmatpush.xpose.msra.mxu3 %v93_v59  ;;  %v208_v59 = vld [vmem:[#allocation2 + $0x30] sm:$0xff] }
  0x43   :  { %133 = vmatpush.xpose.msra.mxu0 %v44_v60  ;;  %v209_v60 = vld [vmem:[#allocation2 + $0x38] sm:$0xff] }
  0x44   :  { %153 = vmatpush.xpose.msra.mxu1 %v60_v61  ;;  %v202_v61 = vld [vmem:[#allocation2] sm:$0xff] }
  0x45   :  { %173 = vmatpush.xpose.msra.mxu2 %v76_v62  ;;  %v203_v62 = vld [vmem:[#allocation2 + $0x8] sm:$0xff] }
  0x46   :  { %193 = vmatpush.xpose.msra.mxu3 %v92_v63  ;;  %134 = vmatmul.f32.vlgmr.msra.gmra.mxu0 %v43_v2  ;;  %v326_v63 = vld [vmem:[#allocation2 + $0x3e0] sm:$0xff] }
  0x47   :  { %468 = vmatpush.xpose.msrb.mxu0 %v262_v0  ;;  %154 = vmatmul.f32.vlgmr.msra.gmra.mxu1 %v43_v2  ;;  %v327_v0 = vld [vmem:[#allocation2 + $0x3e8] sm:$0xff] }
  0x48   :  { %488 = vmatpush.xpose.msrb.mxu1 %v263_v1  ;;  %174 = vmatmul.f32.vlgmr.msra.gmra.mxu2 %v43_v2  ;;  %v204_v1 = vld [vmem:[#allocation2 + $0x10] sm:$0xff] }
  0x49   :  { %194 = vmatmul.f32.vlgmr.msra.gmra.mxu3 %v43_v2  ;;  %508 = vmatpush.xpose.msrb.mxu2 %v264_v3  ;;  %v205_v2 = vld [vmem:[#allocation2 + $0x18] sm:$0xff]  ;;  %v328_v3 = vld [vmem:[#allocation2 + $0x3f0] sm:$0xff] }
  0x4a   :  { %528 = vmatpush.xpose.msrb.mxu3 %v265_v4  ;;  %v329_v4 = vld [vmem:[#allocation2 + $0x3f8] sm:$0xff] }
  0x4b   :  { %469 = vmatpush.xpose.msrb.mxu0 %v258_v5  ;;  %v322_v5 = vld [vmem:[#allocation2 + $0x3c0] sm:$0xff] }
  0x4c   :  { %489 = vmatpush.xpose.msrb.mxu1 %v259_v6  ;;  %v323_v6 = vld [vmem:[#allocation2 + $0x3c8] sm:$0xff] }
  0x4d   :  { %509 = vmatpush.xpose.msrb.mxu2 %v260_v7  ;;  %v324_v7 = vld [vmem:[#allocation2 + $0x3d0] sm:$0xff] }
  0x4e   :  { %529 = vmatpush.xpose.msrb.mxu3 %v261_v8  ;;  %v325_v8 = vld [vmem:[#allocation2 + $0x3d8] sm:$0xff] }
  0x4f   :  { %470 = vmatpush.xpose.msrb.mxu0 %v254_v9  ;;  %v318_v9 = vld [vmem:[#allocation2 + $0x3a0] sm:$0xff] }
  0x50   :  { %490 = vmatpush.xpose.msrb.mxu1 %v255_v10  ;;  %v319_v10 = vld [vmem:[#allocation2 + $0x3a8] sm:$0xff] }
  0x51   :  { %510 = vmatpush.xpose.msrb.mxu2 %v256_v11  ;;  %v320_v11 = vld [vmem:[#allocation2 + $0x3b0] sm:$0xff] }
  0x52   :  { %530 = vmatpush.xpose.msrb.mxu3 %v257_v12  ;;  %v321_v12 = vld [vmem:[#allocation2 + $0x3b8] sm:$0xff] }
  0x53   :  { %471 = vmatpush.xpose.msrb.mxu0 %v250_v13  ;;  %v314_v13 = vld [vmem:[#allocation2 + $0x380] sm:$0xff] }
  0x54   :  { %491 = vmatpush.xpose.msrb.mxu1 %v251_v14  ;;  %v315_v14 = vld [vmem:[#allocation2 + $0x388] sm:$0xff] }
  0x55   :  { %511 = vmatpush.xpose.msrb.mxu2 %v252_v15  ;;  %v316_v15 = vld [vmem:[#allocation2 + $0x390] sm:$0xff] }
  0x56   :  { %531 = vmatpush.xpose.msrb.mxu3 %v253_v16  ;;  %v317_v16 = vld [vmem:[#allocation2 + $0x398] sm:$0xff] }
  0x57   :  { %472 = vmatpush.xpose.msrb.mxu0 %v246_v17  ;;  %v310_v17 = vld [vmem:[#allocation2 + $0x360] sm:$0xff] }
  0x58   :  { %492 = vmatpush.xpose.msrb.mxu1 %v247_v18  ;;  %v311_v18 = vld [vmem:[#allocation2 + $0x368] sm:$0xff] }
  0x59   :  { %512 = vmatpush.xpose.msrb.mxu2 %v248_v19  ;;  %v312_v19 = vld [vmem:[#allocation2 + $0x370] sm:$0xff] }
  0x5a   :  { %532 = vmatpush.xpose.msrb.mxu3 %v249_v20  ;;  %v313_v20 = vld [vmem:[#allocation2 + $0x378] sm:$0xff] }
  0x5b   :  { %473 = vmatpush.xpose.msrb.mxu0 %v242_v21  ;;  %v306_v21 = vld [vmem:[#allocation2 + $0x340] sm:$0xff] }
  0x5c   :  { %493 = vmatpush.xpose.msrb.mxu1 %v243_v22  ;;  %v307_v22 = vld [vmem:[#allocation2 + $0x348] sm:$0xff] }
  0x5d   :  { %513 = vmatpush.xpose.msrb.mxu2 %v244_v23  ;;  %v308_v23 = vld [vmem:[#allocation2 + $0x350] sm:$0xff] }
  0x5e   :  { %533 = vmatpush.xpose.msrb.mxu3 %v245_v24  ;;  %v309_v24 = vld [vmem:[#allocation2 + $0x358] sm:$0xff] }
  0x5f   :  { %474 = vmatpush.xpose.msrb.mxu0 %v238_v25  ;;  %v302_v25 = vld [vmem:[#allocation2 + $0x320] sm:$0xff] }
  0x60   :  { %494 = vmatpush.xpose.msrb.mxu1 %v239_v26  ;;  %v303_v26 = vld [vmem:[#allocation2 + $0x328] sm:$0xff] }
  0x61   :  { %514 = vmatpush.xpose.msrb.mxu2 %v240_v27  ;;  %v304_v27 = vld [vmem:[#allocation2 + $0x330] sm:$0xff] }
  0x62   :  { %534 = vmatpush.xpose.msrb.mxu3 %v241_v28  ;;  %v305_v28 = vld [vmem:[#allocation2 + $0x338] sm:$0xff] }
  0x63   :  { %475 = vmatpush.xpose.msrb.mxu0 %v234_v29  ;;  %v298_v29 = vld [vmem:[#allocation2 + $0x300] sm:$0xff] }
  0x64   :  { %495 = vmatpush.xpose.msrb.mxu1 %v235_v30  ;;  %v299_v30 = vld [vmem:[#allocation2 + $0x308] sm:$0xff] }
  0x65   :  { %515 = vmatpush.xpose.msrb.mxu2 %v236_v31  ;;  %v300_v31 = vld [vmem:[#allocation2 + $0x310] sm:$0xff] }
  0x66   :  { %535 = vmatpush.xpose.msrb.mxu3 %v237_v32  ;;  %v301_v32 = vld [vmem:[#allocation2 + $0x318] sm:$0xff] }
  0x67   :  { %476 = vmatpush.xpose.msrb.mxu0 %v230_v33  ;;  %v294_v33 = vld [vmem:[#allocation2 + $0x2e0] sm:$0xff] }
  0x68   :  { %496 = vmatpush.xpose.msrb.mxu1 %v231_v34  ;;  %v295_v34 = vld [vmem:[#allocation2 + $0x2e8] sm:$0xff] }
  0x69   :  { %516 = vmatpush.xpose.msrb.mxu2 %v232_v35  ;;  %v296_v35 = vld [vmem:[#allocation2 + $0x2f0] sm:$0xff] }
  0x6a   :  { %536 = vmatpush.xpose.msrb.mxu3 %v233_v36  ;;  %v297_v36 = vld [vmem:[#allocation2 + $0x2f8] sm:$0xff] }
  0x6b   :  { %477 = vmatpush.xpose.msrb.mxu0 %v226_v37  ;;  %v290_v37 = vld [vmem:[#allocation2 + $0x2c0] sm:$0xff] }
  0x6c   :  { %497 = vmatpush.xpose.msrb.mxu1 %v227_v38  ;;  %v291_v38 = vld [vmem:[#allocation2 + $0x2c8] sm:$0xff] }
  0x6d   :  { %517 = vmatpush.xpose.msrb.mxu2 %v228_v39  ;;  %v292_v39 = vld [vmem:[#allocation2 + $0x2d0] sm:$0xff] }
  0x6e   :  { %537 = vmatpush.xpose.msrb.mxu3 %v229_v40  ;;  %v293_v40 = vld [vmem:[#allocation2 + $0x2d8] sm:$0xff] }
  0x6f   :  { %478 = vmatpush.xpose.msrb.mxu0 %v222_v41  ;;  %v286_v41 = vld [vmem:[#allocation2 + $0x2a0] sm:$0xff] }
  0x70   :  { %498 = vmatpush.xpose.msrb.mxu1 %v223_v42  ;;  %v287_v42 = vld [vmem:[#allocation2 + $0x2a8] sm:$0xff] }
  0x71   :  { %518 = vmatpush.xpose.msrb.mxu2 %v224_v43  ;;  %v288_v43 = vld [vmem:[#allocation2 + $0x2b0] sm:$0xff] }
  0x72   :  { %538 = vmatpush.xpose.msrb.mxu3 %v225_v44  ;;  %v289_v44 = vld [vmem:[#allocation2 + $0x2b8] sm:$0xff] }
  0x73   :  { %479 = vmatpush.xpose.msrb.mxu0 %v218_v45  ;;  %v282_v45 = vld [vmem:[#allocation2 + $0x280] sm:$0xff] }
  0x74   :  { %499 = vmatpush.xpose.msrb.mxu1 %v219_v46  ;;  %v283_v46 = vld [vmem:[#allocation2 + $0x288] sm:$0xff] }
  0x75   :  { %519 = vmatpush.xpose.msrb.mxu2 %v220_v47  ;;  %v284_v47 = vld [vmem:[#allocation2 + $0x290] sm:$0xff] }
  0x76   :  { %539 = vmatpush.xpose.msrb.mxu3 %v221_v48  ;;  %v285_v48 = vld [vmem:[#allocation2 + $0x298] sm:$0xff] }
  0x77   :  { %480 = vmatpush.xpose.msrb.mxu0 %v214_v49  ;;  %v278_v49 = vld [vmem:[#allocation2 + $0x260] sm:$0xff] }
  0x78   :  { %500 = vmatpush.xpose.msrb.mxu1 %v215_v50  ;;  %v279_v50 = vld [vmem:[#allocation2 + $0x268] sm:$0xff] }
  0x79   :  { %520 = vmatpush.xpose.msrb.mxu2 %v216_v51  ;;  %v280_v51 = vld [vmem:[#allocation2 + $0x270] sm:$0xff] }
  0x7a   :  { %540 = vmatpush.xpose.msrb.mxu3 %v217_v52  ;;  %v281_v52 = vld [vmem:[#allocation2 + $0x278] sm:$0xff] }
  0x7b   :  { %481 = vmatpush.xpose.msrb.mxu0 %v210_v53  ;;  %v274_v53 = vld [vmem:[#allocation2 + $0x240] sm:$0xff] }
  0x7c   :  { %501 = vmatpush.xpose.msrb.mxu1 %v211_v54  ;;  %v275_v54 = vld [vmem:[#allocation2 + $0x248] sm:$0xff] }
  0x7d   :  { %521 = vmatpush.xpose.msrb.mxu2 %v212_v55  ;;  %v276_v55 = vld [vmem:[#allocation2 + $0x250] sm:$0xff] }
  0x7e   :  { %541 = vmatpush.xpose.msrb.mxu3 %v213_v56  ;;  %v277_v56 = vld [vmem:[#allocation2 + $0x258] sm:$0xff] }
  0x7f   :  { %482 = vmatpush.xpose.msrb.mxu0 %v206_v57  ;;  %v270_v57 = vld [vmem:[#allocation2 + $0x220] sm:$0xff] }
  0x80   :  { %502 = vmatpush.xpose.msrb.mxu1 %v207_v58  ;;  %v271_v58 = vld [vmem:[#allocation2 + $0x228] sm:$0xff] }
  0x81   :  { %522 = vmatpush.xpose.msrb.mxu2 %v208_v59  ;;  %v272_v59 = vld [vmem:[#allocation2 + $0x230] sm:$0xff] }
  0x82   :  { %542 = vmatpush.xpose.msrb.mxu3 %v209_v60  ;;  %v273_v60 = vld [vmem:[#allocation2 + $0x238] sm:$0xff] }
  0x83   :  { %483 = vmatpush.xpose.msrb.mxu0 %v202_v61  ;;  %v266_v61 = vld [vmem:[#allocation2 + $0x200] sm:$0xff] }
  0x84   :  { %503 = vmatpush.xpose.msrb.mxu1 %v203_v62  ;;  %v267_v62 = vld [vmem:[#allocation2 + $0x208] sm:$0xff] }
  0x85   :  { %523 = vmatpush.xpose.msrb.mxu2 %v204_v1  ;;  %v269_v1 = vld [vmem:[#allocation2 + $0x218] sm:$0xff] }
  0x86   :  { %543 = vmatpush.xpose.msrb.mxu3 %v205_v2 }
  0x87   :  { %548 = vmatpush.xpose.msra.mxu0 %v326_v63  ;;  %v108_v63 = vld [vmem:[%s1493_s2] sm:$0xf] }
  0x88   :  { %568 = vmatpush.xpose.msra.mxu1 %v327_v0  ;;  %v268_v0 = vld [vmem:[#allocation2 + $0x210] sm:$0xff]  ;;  %v110_v2 = vperm.slane %v108_v63, 0 }
  0x89   :  { %588 = vmatpush.xpose.msra.mxu2 %v328_v3  ;;  %v111_v3 = vperm.slane %v108_v63, 1 }
  0x8a   :  { %608 = vmatpush.xpose.msra.mxu3 %v329_v4 }
  0x8b   :  { %549 = vmatpush.xpose.msra.mxu0 %v322_v5 }
  0x8c   :  { %569 = vmatpush.xpose.msra.mxu1 %v323_v6 }
  0x8d   :  { %589 = vmatpush.xpose.msra.mxu2 %v324_v7 }
  0x8e   :  { %609 = vmatpush.xpose.msra.mxu3 %v325_v8 }
  0x8f   :  { %550 = vmatpush.xpose.msra.mxu0 %v318_v9 }
  0x90   :  { %570 = vmatpush.xpose.msra.mxu1 %v319_v10  ;;  %v390_v10 = vld [vmem:[#allocation2 + $0x5e0] sm:$0xff] }
  0x91   :  { %590 = vmatpush.xpose.msra.mxu2 %v320_v11  ;;  %v391_v11 = vld [vmem:[#allocation2 + $0x5e8] sm:$0xff] }
  0x92   :  { %610 = vmatpush.xpose.msra.mxu3 %v321_v12  ;;  %v112_v12 = vperm.slane %v108_v63, 2 }
  0x93   :  { %551 = vmatpush.xpose.msra.mxu0 %v314_v13  ;;  %v113_v13 = vperm.slane %v108_v63, 3  ;;  %v353_v63 = vld [vmem:[#allocation2 + $0x4b8] sm:$0xff] }
  0x94   :  { %571 = vmatpush.xpose.msra.mxu1 %v315_v14 }
  0x95   :  { %591 = vmatpush.xpose.msra.mxu2 %v316_v15 }
  0x96   :  { %611 = vmatpush.xpose.msra.mxu3 %v317_v16  ;;  %v386_v16 = vld [vmem:[#allocation2 + $0x5c0] sm:$0xff] }
  0x97   :  { %552 = vmatpush.xpose.msra.mxu0 %v310_v17  ;;  %v387_v17 = vld [vmem:[#allocation2 + $0x5c8] sm:$0xff] }
  0x98   :  { %572 = vmatpush.xpose.msra.mxu1 %v311_v18 }
  0x99   :  { %592 = vmatpush.xpose.msra.mxu2 %v312_v19 }
  0x9a   :  { %612 = vmatpush.xpose.msra.mxu3 %v313_v20 }
  0x9b   :  { %553 = vmatpush.xpose.msra.mxu0 %v306_v21 }
  0x9c   :  { %573 = vmatpush.xpose.msra.mxu1 %v307_v22  ;;  %v392_v22 = vld [vmem:[#allocation2 + $0x5f0] sm:$0xff] }
  0x9d   :  { %593 = vmatpush.xpose.msra.mxu2 %v308_v23  ;;  %v393_v23 = vld [vmem:[#allocation2 + $0x5f8] sm:$0xff] }
  0x9e   :  { %613 = vmatpush.xpose.msra.mxu3 %v309_v24  ;;  %v383_v24 = vld [vmem:[#allocation2 + $0x5a8] sm:$0xff] }
  0x9f   :  { %554 = vmatpush.xpose.msra.mxu0 %v302_v25  ;;  %v382_v25 = vld [vmem:[#allocation2 + $0x5a0] sm:$0xff] }
  0xa0   :  { %574 = vmatpush.xpose.msra.mxu1 %v303_v26  ;;  %v388_v26 = vld [vmem:[#allocation2 + $0x5d0] sm:$0xff] }
  0xa1   :  { %594 = vmatpush.xpose.msra.mxu2 %v304_v27  ;;  %v389_v27 = vld [vmem:[#allocation2 + $0x5d8] sm:$0xff] }
  0xa2   :  { %614 = vmatpush.xpose.msra.mxu3 %v305_v28  ;;  %v379_v28 = vld [vmem:[#allocation2 + $0x588] sm:$0xff] }
  0xa3   :  { %555 = vmatpush.xpose.msra.mxu0 %v298_v29  ;;  %v378_v29 = vld [vmem:[#allocation2 + $0x580] sm:$0xff] }
  0xa4   :  { %575 = vmatpush.xpose.msra.mxu1 %v299_v30  ;;  %v384_v30 = vld [vmem:[#allocation2 + $0x5b0] sm:$0xff] }
  0xa5   :  { %595 = vmatpush.xpose.msra.mxu2 %v300_v31  ;;  %v385_v31 = vld [vmem:[#allocation2 + $0x5b8] sm:$0xff] }
  0xa6   :  { %615 = vmatpush.xpose.msra.mxu3 %v301_v32  ;;  %v375_v32 = vld [vmem:[#allocation2 + $0x568] sm:$0xff] }
  0xa7   :  { %556 = vmatpush.xpose.msra.mxu0 %v294_v33  ;;  %v374_v33 = vld [vmem:[#allocation2 + $0x560] sm:$0xff] }
  0xa8   :  { %576 = vmatpush.xpose.msra.mxu1 %v295_v34  ;;  %v380_v34 = vld [vmem:[#allocation2 + $0x590] sm:$0xff] }
  0xa9   :  { %596 = vmatpush.xpose.msra.mxu2 %v296_v35  ;;  %v381_v35 = vld [vmem:[#allocation2 + $0x598] sm:$0xff] }
  0xaa   :  { %616 = vmatpush.xpose.msra.mxu3 %v297_v36  ;;  %v371_v36 = vld [vmem:[#allocation2 + $0x548] sm:$0xff] }
  0xab   :  { %557 = vmatpush.xpose.msra.mxu0 %v290_v37  ;;  %v370_v37 = vld [vmem:[#allocation2 + $0x540] sm:$0xff] }
  0xac   :  { %577 = vmatpush.xpose.msra.mxu1 %v291_v38  ;;  %v376_v38 = vld [vmem:[#allocation2 + $0x570] sm:$0xff] }
  0xad   :  { %597 = vmatpush.xpose.msra.mxu2 %v292_v39  ;;  %v377_v39 = vld [vmem:[#allocation2 + $0x578] sm:$0xff] }
  0xae   :  { %617 = vmatpush.xpose.msra.mxu3 %v293_v40  ;;  %v367_v40 = vld [vmem:[#allocation2 + $0x528] sm:$0xff] }
  0xaf   :  { %558 = vmatpush.xpose.msra.mxu0 %v286_v41  ;;  %v366_v41 = vld [vmem:[#allocation2 + $0x520] sm:$0xff] }
  0xb0   :  { %578 = vmatpush.xpose.msra.mxu1 %v287_v42  ;;  %v372_v42 = vld [vmem:[#allocation2 + $0x550] sm:$0xff] }
  0xb1   :  { %598 = vmatpush.xpose.msra.mxu2 %v288_v43  ;;  %v373_v43 = vld [vmem:[#allocation2 + $0x558] sm:$0xff] }
  0xb2   :  { %618 = vmatpush.xpose.msra.mxu3 %v289_v44  ;;  %v363_v44 = vld [vmem:[#allocation2 + $0x508] sm:$0xff] }
  0xb3   :  { %559 = vmatpush.xpose.msra.mxu0 %v282_v45  ;;  %v362_v45 = vld [vmem:[#allocation2 + $0x500] sm:$0xff] }
  0xb4   :  { %579 = vmatpush.xpose.msra.mxu1 %v283_v46  ;;  %v368_v46 = vld [vmem:[#allocation2 + $0x530] sm:$0xff] }
  0xb5   :  { %599 = vmatpush.xpose.msra.mxu2 %v284_v47  ;;  %v369_v47 = vld [vmem:[#allocation2 + $0x538] sm:$0xff] }
  0xb6   :  { %619 = vmatpush.xpose.msra.mxu3 %v285_v48  ;;  %v359_v48 = vld [vmem:[#allocation2 + $0x4e8] sm:$0xff] }
  0xb7   :  { %560 = vmatpush.xpose.msra.mxu0 %v278_v49  ;;  %v358_v49 = vld [vmem:[#allocation2 + $0x4e0] sm:$0xff] }
  0xb8   :  { %580 = vmatpush.xpose.msra.mxu1 %v279_v50  ;;  %v364_v50 = vld [vmem:[#allocation2 + $0x510] sm:$0xff] }
  0xb9   :  { %600 = vmatpush.xpose.msra.mxu2 %v280_v51  ;;  %v365_v51 = vld [vmem:[#allocation2 + $0x518] sm:$0xff] }
  0xba   :  { %620 = vmatpush.xpose.msra.mxu3 %v281_v52  ;;  %v355_v52 = vld [vmem:[#allocation2 + $0x4c8] sm:$0xff] }
  0xbb   :  { %561 = vmatpush.xpose.msra.mxu0 %v274_v53  ;;  %v354_v53 = vld [vmem:[#allocation2 + $0x4c0] sm:$0xff] }
  0xbc   :  { %581 = vmatpush.xpose.msra.mxu1 %v275_v54  ;;  %v360_v54 = vld [vmem:[#allocation2 + $0x4f0] sm:$0xff] }
  0xbd   :  { %601 = vmatpush.xpose.msra.mxu2 %v276_v55  ;;  %v361_v55 = vld [vmem:[#allocation2 + $0x4f8] sm:$0xff] }
  0xbe   :  { %621 = vmatpush.xpose.msra.mxu3 %v277_v56  ;;  %v351_v56 = vld [vmem:[#allocation2 + $0x4a8] sm:$0xff] }
  0xbf   :  { %562 = vmatpush.xpose.msra.mxu0 %v270_v57  ;;  %v350_v57 = vld [vmem:[#allocation2 + $0x4a0] sm:$0xff] }
  0xc0   :  { %582 = vmatpush.xpose.msra.mxu1 %v271_v58  ;;  %v356_v58 = vld [vmem:[#allocation2 + $0x4d0] sm:$0xff] }
  0xc1   :  { %602 = vmatpush.xpose.msra.mxu2 %v272_v59  ;;  %v357_v59 = vld [vmem:[#allocation2 + $0x4d8] sm:$0xff] }
  0xc2   :  { %622 = vmatpush.xpose.msra.mxu3 %v273_v60  ;;  %v347_v60 = vld [vmem:[#allocation2 + $0x488] sm:$0xff] }
  0xc3   :  { %563 = vmatpush.xpose.msra.mxu0 %v266_v61  ;;  %v135_v4 = vpop.f32.mrf.mxu0  ;;  %v346_v61 = vld [vmem:[#allocation2 + $0x480] sm:$0xff] }
  0xc4   :  { %583 = vmatpush.xpose.msra.mxu1 %v267_v62  ;;  %v155_v5 = vpop.f32.mrf.mxu1  ;;  %v136_v6 = vadd.f32 %v135_v4, %v110_v2  ;;  %v352_v62 = vld [vmem:[#allocation2 + $0x4b0] sm:$0xff]  ;;  %v339_v4 = vld [vmem:[#allocation2 + $0x448] sm:$0xff] }
  0xc5   :  { %603 = vmatpush.xpose.msra.mxu2 %v268_v0  ;;  %v156_v7 = vadd.f32 %v155_v5, %v111_v3  ;;  %v343_v0 = vld [vmem:[#allocation2 + $0x468] sm:$0xff]  ;;  %v348_v2 = vld [vmem:[#allocation2 + $0x490] sm:$0xff]  ;;  %v349_v3 = vld [vmem:[#allocation2 + $0x498] sm:$0xff] }
  0xc6   :  { %623 = vmatpush.xpose.msra.mxu3 %v269_v1  ;;  %v1260_v8 = vmax.f32 %v136_v6, 0.0  ;;  %v342_v1 = vld [vmem:[#allocation2 + $0x460] sm:$0xff]  ;;  %v344_v6 = vld [vmem:[#allocation2 + $0x470] sm:$0xff] }
  0xc7   :  { %v1262_v9 = vmax.f32 %v156_v7, 0.0  ;;  %v338_v5 = vld [vmem:[#allocation2 + $0x440] sm:$0xff]  ;;  %v345_v7 = vld [vmem:[#allocation2 + $0x478] sm:$0xff] }
  0xc8   :  { %484 = vmatmul.f32.vlgmr.msrb.gmra.mxu0 %v1260_v8 }
  0xc9   :  { %504 = vmatmul.f32.vlgmr.msrb.gmra.mxu1 %v1262_v9  ;;  %628 = vmatpush.xpose.msrb.mxu0 %v390_v10  ;;  %v335_v10 = vld [vmem:[#allocation2 + $0x428] sm:$0xff] }
  0xca   :  { %648 = vmatpush.xpose.msrb.mxu1 %v391_v11  ;;  %v334_v11 = vld [vmem:[#allocation2 + $0x420] sm:$0xff] }
  0xcb   :  { %v175_v14 = vpop.f32.mrf.mxu2 }
  0xcc   :  { %v195_v15 = vpop.f32.mrf.mxu3  ;;  %v176_v18 = vadd.f32 %v175_v14, %v112_v12  ;;  %v340_v12 = vld [vmem:[#allocation2 + $0x450] sm:$0xff]  ;;  %v331_v14 = vld [vmem:[#allocation2 + $0x408] sm:$0xff] }
  0xcd   :  { %v196_v19 = vadd.f32 %v195_v15, %v113_v13  ;;  %629 = vmatpush.xpose.msrb.mxu0 %v386_v16  ;;  %v341_v13 = vld [vmem:[#allocation2 + $0x458] sm:$0xff]  ;;  %v330_v15 = vld [vmem:[#allocation2 + $0x400] sm:$0xff]  ;;  %v455_v16 = vld [vmem:[#allocation2 + $0x7e8] sm:$0xff] }
  0xce   :  { %v1266_v20 = vmax.f32 %v176_v18, 0.0  ;;  %649 = vmatpush.xpose.msrb.mxu1 %v387_v17  ;;  %v454_v17 = vld [vmem:[#allocation2 + $0x7e0] sm:$0xff]  ;;  %v336_v18 = vld [vmem:[#allocation2 + $0x430] sm:$0xff] }
  0xcf   :  { %v1268_v21 = vmax.f32 %v196_v19, 0.0  ;;  %v337_v19 = vld [vmem:[#allocation2 + $0x438] sm:$0xff] }
  0xd0   :  { %524 = vmatmul.f32.vlgmr.msrb.gmra.mxu2 %v1266_v20  ;;  %564 = vmatmul.f32.vlgmr.msra.gmra.mxu0 %v1260_v8 }
  0xd1   :  { %544 = vmatmul.f32.vlgmr.msrb.gmra.mxu3 %v1268_v21  ;;  %668 = vmatpush.xpose.msrb.mxu2 %v392_v22  ;;  %v451_v22 = vld [vmem:[#allocation2 + $0x7c8] sm:$0xff] }
  0xd2   :  { %688 = vmatpush.xpose.msrb.mxu3 %v393_v23  ;;  %650 = vmatpush.xpose.msrb.mxu1 %v383_v24  ;;  %v450_v23 = vld [vmem:[#allocation2 + $0x7c0] sm:$0xff]  ;;  %v332_v24 = vld [vmem:[#allocation2 + $0x410] sm:$0xff] }
  0xd3   :  { %630 = vmatpush.xpose.msrb.mxu0 %v382_v25  ;;  %584 = vmatmul.f32.vlgmr.msra.gmra.mxu1 %v1262_v9  ;;  %v333_v25 = vld [vmem:[#allocation2 + $0x418] sm:$0xff] }
  0xd5   :  { %669 = vmatpush.xpose.msrb.mxu2 %v388_v26  ;;  %v456_v26 = vld [vmem:[#allocation2 + $0x7f0] sm:$0xff] }
  0xd6   :  { %689 = vmatpush.xpose.msrb.mxu3 %v389_v27  ;;  %651 = vmatpush.xpose.msrb.mxu1 %v379_v28  ;;  %v457_v27 = vld [vmem:[#allocation2 + $0x7f8] sm:$0xff]  ;;  %v447_v28 = vld [vmem:[#allocation2 + $0x7a8] sm:$0xff] }
  0xd7   :  { %631 = vmatpush.xpose.msrb.mxu0 %v378_v29  ;;  %v446_v29 = vld [vmem:[#allocation2 + $0x7a0] sm:$0xff] }
  0xd8   :  { %604 = vmatmul.f32.vlgmr.msra.gmra.mxu2 %v1266_v20 }
  0xd9   :  { %624 = vmatmul.f32.vlgmr.msra.gmra.mxu3 %v1268_v21  ;;  %670 = vmatpush.xpose.msrb.mxu2 %v384_v30  ;;  %v452_v30 = vld [vmem:[#allocation2 + $0x7d0] sm:$0xff] }
  0xda   :  { %690 = vmatpush.xpose.msrb.mxu3 %v385_v31  ;;  %652 = vmatpush.xpose.msrb.mxu1 %v375_v32  ;;  %v453_v31 = vld [vmem:[#allocation2 + $0x7d8] sm:$0xff]  ;;  %v443_v32 = vld [vmem:[#allocation2 + $0x788] sm:$0xff] }
  0xdb   :  { %632 = vmatpush.xpose.msrb.mxu0 %v374_v33  ;;  %v442_v33 = vld [vmem:[#allocation2 + $0x780] sm:$0xff] }
  0xdd   :  { %671 = vmatpush.xpose.msrb.mxu2 %v380_v34  ;;  %v448_v34 = vld [vmem:[#allocation2 + $0x7b0] sm:$0xff] }
  0xde   :  { %691 = vmatpush.xpose.msrb.mxu3 %v381_v35  ;;  %653 = vmatpush.xpose.msrb.mxu1 %v371_v36  ;;  %v449_v35 = vld [vmem:[#allocation2 + $0x7b8] sm:$0xff]  ;;  %v439_v36 = vld [vmem:[#allocation2 + $0x768] sm:$0xff] }
  0xdf   :  { %633 = vmatpush.xpose.msrb.mxu0 %v370_v37  ;;  %v438_v37 = vld [vmem:[#allocation2 + $0x760] sm:$0xff] }
  0xe1   :  { %672 = vmatpush.xpose.msrb.mxu2 %v376_v38  ;;  %v444_v38 = vld [vmem:[#allocation2 + $0x790] sm:$0xff] }
  0xe2   :  { %692 = vmatpush.xpose.msrb.mxu3 %v377_v39  ;;  %654 = vmatpush.xpose.msrb.mxu1 %v367_v40  ;;  %v445_v39 = vld [vmem:[#allocation2 + $0x798] sm:$0xff]  ;;  %v435_v40 = vld [vmem:[#allocation2 + $0x748] sm:$0xff] }
  0xe3   :  { %634 = vmatpush.xpose.msrb.mxu0 %v366_v41  ;;  %v434_v41 = vld [vmem:[#allocation2 + $0x740] sm:$0xff] }
  0xe5   :  { %673 = vmatpush.xpose.msrb.mxu2 %v372_v42  ;;  %v440_v42 = vld [vmem:[#allocation2 + $0x770] sm:$0xff] }
  0xe6   :  { %693 = vmatpush.xpose.msrb.mxu3 %v373_v43  ;;  %655 = vmatpush.xpose.msrb.mxu1 %v363_v44  ;;  %v441_v43 = vld [vmem:[#allocation2 + $0x778] sm:$0xff]  ;;  %v431_v44 = vld [vmem:[#allocation2 + $0x728] sm:$0xff] }
  0xe7   :  { %635 = vmatpush.xpose.msrb.mxu0 %v362_v45  ;;  %v430_v45 = vld [vmem:[#allocation2 + $0x720] sm:$0xff] }
  0xe9   :  { %674 = vmatpush.xpose.msrb.mxu2 %v368_v46  ;;  %v436_v46 = vld [vmem:[#allocation2 + $0x750] sm:$0xff] }
  0xea   :  { %694 = vmatpush.xpose.msrb.mxu3 %v369_v47  ;;  %656 = vmatpush.xpose.msrb.mxu1 %v359_v48  ;;  %v437_v47 = vld [vmem:[#allocation2 + $0x758] sm:$0xff]  ;;  %v427_v48 = vld [vmem:[#allocation2 + $0x708] sm:$0xff] }
  0xeb   :  { %636 = vmatpush.xpose.msrb.mxu0 %v358_v49  ;;  %v426_v49 = vld [vmem:[#allocation2 + $0x700] sm:$0xff] }
  0xed   :  { %675 = vmatpush.xpose.msrb.mxu2 %v364_v50  ;;  %v432_v50 = vld [vmem:[#allocation2 + $0x730] sm:$0xff] }
  0xee   :  { %695 = vmatpush.xpose.msrb.mxu3 %v365_v51  ;;  %657 = vmatpush.xpose.msrb.mxu1 %v355_v52  ;;  %v433_v51 = vld [vmem:[#allocation2 + $0x738] sm:$0xff]  ;;  %v423_v52 = vld [vmem:[#allocation2 + $0x6e8] sm:$0xff] }
  0xef   :  { %637 = vmatpush.xpose.msrb.mxu0 %v354_v53  ;;  %v422_v53 = vld [vmem:[#allocation2 + $0x6e0] sm:$0xff] }
  0xf1   :  { %676 = vmatpush.xpose.msrb.mxu2 %v360_v54  ;;  %v428_v54 = vld [vmem:[#allocation2 + $0x710] sm:$0xff] }
  0xf2   :  { %696 = vmatpush.xpose.msrb.mxu3 %v361_v55  ;;  %658 = vmatpush.xpose.msrb.mxu1 %v351_v56  ;;  %v429_v55 = vld [vmem:[#allocation2 + $0x718] sm:$0xff]  ;;  %v419_v56 = vld [vmem:[#allocation2 + $0x6c8] sm:$0xff] }
  0xf3   :  { %638 = vmatpush.xpose.msrb.mxu0 %v350_v57  ;;  %v418_v57 = vld [vmem:[#allocation2 + $0x6c0] sm:$0xff] }
  0xf5   :  { %677 = vmatpush.xpose.msrb.mxu2 %v356_v58  ;;  %v424_v58 = vld [vmem:[#allocation2 + $0x6f0] sm:$0xff] }
  0xf6   :  { %697 = vmatpush.xpose.msrb.mxu3 %v357_v59  ;;  %659 = vmatpush.xpose.msrb.mxu1 %v347_v60  ;;  %v425_v59 = vld [vmem:[#allocation2 + $0x6f8] sm:$0xff]  ;;  %v415_v60 = vld [vmem:[#allocation2 + $0x6a8] sm:$0xff] }
  0xf7   :  { %639 = vmatpush.xpose.msrb.mxu0 %v346_v61  ;;  %v414_v61 = vld [vmem:[#allocation2 + $0x6a0] sm:$0xff] }
  0xf9   :  { %678 = vmatpush.xpose.msrb.mxu2 %v352_v62  ;;  %v420_v62 = vld [vmem:[#allocation2 + $0x6d0] sm:$0xff] }
  0xfa   :  { %698 = vmatpush.xpose.msrb.mxu3 %v353_v63  ;;  %660 = vmatpush.xpose.msrb.mxu1 %v343_v0  ;;  %v421_v63 = vld [vmem:[#allocation2 + $0x6d8] sm:$0xff]  ;;  %v411_v0 = vld [vmem:[#allocation2 + $0x688] sm:$0xff] }
  0xfb   :  { %640 = vmatpush.xpose.msrb.mxu0 %v342_v1  ;;  %v410_v1 = vld [vmem:[#allocation2 + $0x680] sm:$0xff] }
  0xfd   :  { %679 = vmatpush.xpose.msrb.mxu2 %v348_v2  ;;  %v416_v2 = vld [vmem:[#allocation2 + $0x6b0] sm:$0xff] }
  0xfe   :  { %699 = vmatpush.xpose.msrb.mxu3 %v349_v3  ;;  %661 = vmatpush.xpose.msrb.mxu1 %v339_v4  ;;  %v417_v3 = vld [vmem:[#allocation2 + $0x6b8] sm:$0xff]  ;;  %v407_v4 = vld [vmem:[#allocation2 + $0x668] sm:$0xff] }
  0xff   :  { %641 = vmatpush.xpose.msrb.mxu0 %v338_v5  ;;  %v406_v5 = vld [vmem:[#allocation2 + $0x660] sm:$0xff] }
 0x101   :  { %680 = vmatpush.xpose.msrb.mxu2 %v344_v6  ;;  %v412_v6 = vld [vmem:[#allocation2 + $0x690] sm:$0xff] }
 0x102   :  { %700 = vmatpush.xpose.msrb.mxu3 %v345_v7  ;;  %662 = vmatpush.xpose.msrb.mxu1 %v335_v10  ;;  %v413_v7 = vld [vmem:[#allocation2 + $0x698] sm:$0xff]  ;;  %v403_v10 = vld [vmem:[#allocation2 + $0x648] sm:$0xff] }
 0x103   :  { %642 = vmatpush.xpose.msrb.mxu0 %v334_v11  ;;  %v402_v11 = vld [vmem:[#allocation2 + $0x640] sm:$0xff] }
 0x105   :  { %681 = vmatpush.xpose.msrb.mxu2 %v340_v12  ;;  %v408_v12 = vld [vmem:[#allocation2 + $0x670] sm:$0xff] }
 0x106   :  { %701 = vmatpush.xpose.msrb.mxu3 %v341_v13  ;;  %663 = vmatpush.xpose.msrb.mxu1 %v331_v14  ;;  %v409_v13 = vld [vmem:[#allocation2 + $0x678] sm:$0xff]  ;;  %v399_v14 = vld [vmem:[#allocation2 + $0x628] sm:$0xff] }
 0x107   :  { %643 = vmatpush.xpose.msrb.mxu0 %v330_v15  ;;  %v398_v15 = vld [vmem:[#allocation2 + $0x620] sm:$0xff] }
 0x109   :  { %682 = vmatpush.xpose.msrb.mxu2 %v336_v18  ;;  %664 = vmatmul.f32.vlgmr.msrb.gmra.mxu1 %v1262_v9  ;;  %v395_v18 = vld [vmem:[#allocation2 + $0x608] sm:$0xff] }
 0x10a   :  { %728 = vmatpush.xpose.msra.mxu1 %v455_v16  ;;  %702 = vmatpush.xpose.msrb.mxu3 %v337_v19  ;;  %v404_v16 = vld [vmem:[#allocation2 + $0x650] sm:$0xff]  ;;  %v853_v19 = vld [vmem:[%s1496_s5 + $0x1e8] sm:$0xff] }
 0x10b   :  { %708 = vmatpush.xpose.msra.mxu0 %v454_v17  ;;  %v405_v17 = vld [vmem:[#allocation2 + $0x658] sm:$0xff] }
 0x10c   :  { %644 = vmatmul.f32.vlgmr.msrb.gmra.mxu0 %v1260_v8 }
 0x10d   :  { %683 = vmatpush.xpose.msrb.mxu2 %v332_v24  ;;  %v400_v24 = vld [vmem:[#allocation2 + $0x630] sm:$0xff] }
 0x10e   :  { %729 = vmatpush.xpose.msra.mxu1 %v451_v22  ;;  %703 = vmatpush.xpose.msrb.mxu3 %v333_v25  ;;  %v394_v22 = vld [vmem:[#allocation2 + $0x600] sm:$0xff]  ;;  %v401_v25 = vld [vmem:[#allocation2 + $0x638] sm:$0xff] }
 0x10f   :  { %709 = vmatpush.xpose.msra.mxu0 %v450_v23  ;;  %v852_v23 = vld [vmem:[%s1496_s5 + $0x1e0] sm:$0xff] }
 0x110   :  { %684 = vmatmul.f32.vlgmr.msrb.gmra.mxu2 %v1266_v20 }
 0x111   :  { %748 = vmatpush.xpose.msra.mxu2 %v456_v26  ;;  %704 = vmatmul.f32.vlgmr.msrb.gmra.mxu3 %v1268_v21  ;;  %v849_v26 = vld [vmem:[%s1496_s5 + $0x1c8] sm:$0xff] }
 0x112   :  { %768 = vmatpush.xpose.msra.mxu3 %v457_v27  ;;  %730 = vmatpush.xpose.msra.mxu1 %v447_v28  ;;  %v848_v27 = vld [vmem:[%s1496_s5 + $0x1c0] sm:$0xff]  ;;  %v396_v28 = vld [vmem:[#allocation2 + $0x610] sm:$0xff] }
 0x113   :  { %710 = vmatpush.xpose.msra.mxu0 %v446_v29  ;;  %v397_v29 = vld [vmem:[#allocation2 + $0x618] sm:$0xff] }
 0x115   :  { %749 = vmatpush.xpose.msra.mxu2 %v452_v30  ;;  %v854_v30 = vld [vmem:[%s1496_s5 + $0x1f0] sm:$0xff] }
 0x116   :  { %769 = vmatpush.xpose.msra.mxu3 %v453_v31  ;;  %731 = vmatpush.xpose.msra.mxu1 %v443_v32  ;;  %v845_v31 = vld [vmem:[%s1496_s5 + $0x1a8] sm:$0xff] }
 0x117   :  { %711 = vmatpush.xpose.msra.mxu0 %v442_v33  ;;  %v841_v32 = vld [vmem:[%s1496_s5 + $0x188] sm:$0xff]  ;;  %v840_v33 = vld [vmem:[%s1496_s5 + $0x180] sm:$0xff] }
 0x119   :  { %750 = vmatpush.xpose.msra.mxu2 %v448_v34  ;;  %v846_v34 = vld [vmem:[%s1496_s5 + $0x1b0] sm:$0xff] }
 0x11a   :  { %770 = vmatpush.xpose.msra.mxu3 %v449_v35  ;;  %732 = vmatpush.xpose.msra.mxu1 %v439_v36  ;;  %v842_v35 = vld [vmem:[%s1496_s5 + $0x190] sm:$0xff]  ;;  %v833_v36 = vld [vmem:[%s1496_s5 + $0x148] sm:$0xff] }
 0x11b   :  { %712 = vmatpush.xpose.msra.mxu0 %v438_v37  ;;  %v832_v37 = vld [vmem:[%s1496_s5 + $0x140] sm:$0xff] }
 0x11d   :  { %751 = vmatpush.xpose.msra.mxu2 %v444_v38  ;;  %v838_v38 = vld [vmem:[%s1496_s5 + $0x170] sm:$0xff] }
 0x11e   :  { %771 = vmatpush.xpose.msra.mxu3 %v445_v39  ;;  %733 = vmatpush.xpose.msra.mxu1 %v435_v40  ;;  %v829_v39 = vld [vmem:[%s1496_s5 + $0x128] sm:$0xff]  ;;  %v828_v40 = vld [vmem:[%s1496_s5 + $0x120] sm:$0xff] }
 0x11f   :  { %713 = vmatpush.xpose.msra.mxu0 %v434_v41  ;;  %v834_v41 = vld [vmem:[%s1496_s5 + $0x150] sm:$0xff] }
 0x121   :  { %752 = vmatpush.xpose.msra.mxu2 %v440_v42  ;;  %v825_v42 = vld [vmem:[%s1496_s5 + $0x108] sm:$0xff] }
 0x122   :  { %772 = vmatpush.xpose.msra.mxu3 %v441_v43  ;;  %734 = vmatpush.xpose.msra.mxu1 %v431_v44  ;;  %v824_v43 = vld [vmem:[%s1496_s5 + $0x100] sm:$0xff]  ;;  %v830_v44 = vld [vmem:[%s1496_s5 + $0x130] sm:$0xff] }
 0x123   :  { %714 = vmatpush.xpose.msra.mxu0 %v430_v45  ;;  %v821_v45 = vld [vmem:[%s1496_s5 + $0xe8] sm:$0xff] }
 0x125   :  { %753 = vmatpush.xpose.msra.mxu2 %v436_v46  ;;  %v820_v46 = vld [vmem:[%s1496_s5 + $0xe0] sm:$0xff] }
 0x126   :  { %773 = vmatpush.xpose.msra.mxu3 %v437_v47  ;;  %735 = vmatpush.xpose.msra.mxu1 %v427_v48  ;;  %v826_v47 = vld [vmem:[%s1496_s5 + $0x110] sm:$0xff]  ;;  %v817_v48 = vld [vmem:[%s1496_s5 + $0xc8] sm:$0xff] }
 0x127   :  { %715 = vmatpush.xpose.msra.mxu0 %v426_v49 }
 0x129   :  { %754 = vmatpush.xpose.msra.mxu2 %v432_v50  ;;  %v816_v50 = vld [vmem:[%s1496_s5 + $0xc0] sm:$0xff] }
 0x12a   :  { %774 = vmatpush.xpose.msra.mxu3 %v433_v51  ;;  %736 = vmatpush.xpose.msra.mxu1 %v423_v52  ;;  %v822_v51 = vld [vmem:[%s1496_s5 + $0xf0] sm:$0xff]  ;;  %v813_v52 = vld [vmem:[%s1496_s5 + $0xa8] sm:$0xff] }
 0x12b   :  { %716 = vmatpush.xpose.msra.mxu0 %v422_v53 }
 0x12d   :  { %755 = vmatpush.xpose.msra.mxu2 %v428_v54  ;;  %v812_v54 = vld [vmem:[%s1496_s5 + $0xa0] sm:$0xff] }
 0x12e   :  { %775 = vmatpush.xpose.msra.mxu3 %v429_v55  ;;  %737 = vmatpush.xpose.msra.mxu1 %v419_v56  ;;  %v1380_v55 = vld [vmem:[%s1495_s4] sm:$0xf] }
 0x12f   :  { %717 = vmatpush.xpose.msra.mxu0 %v418_v57  ;;  %v818_v57 = vld [vmem:[%s1496_s5 + $0xd0] sm:$0xff] }
 0x131   :  { %756 = vmatpush.xpose.msra.mxu2 %v424_v58  ;;  %v809_v58 = vld [vmem:[%s1496_s5 + $0x88] sm:$0xff] }
 0x132   :  { %776 = vmatpush.xpose.msra.mxu3 %v425_v59  ;;  %738 = vmatpush.xpose.msra.mxu1 %v415_v60  ;;  %v460_v59 = vperm.slane %v1380_v55, 0  ;;  %v461_v60 = vperm.slane %v1380_v55, 1 }
 0x133   :  { %718 = vmatpush.xpose.msra.mxu0 %v414_v61  ;;  %v808_v61 = vld [vmem:[%s1496_s5 + $0x80] sm:$0xff] }
 0x135   :  { %757 = vmatpush.xpose.msra.mxu2 %v420_v62 }
 0x136   :  { %777 = vmatpush.xpose.msra.mxu3 %v421_v63  ;;  %739 = vmatpush.xpose.msra.mxu1 %v411_v0  ;;  %v814_v63 = vld [vmem:[%s1496_s5 + $0xb0] sm:$0xff]  ;;  %v805_v0 = vld [vmem:[%s1496_s5 + $0x68] sm:$0xff] }
 0x137   :  { %719 = vmatpush.xpose.msra.mxu0 %v410_v1 }
 0x139   :  { %758 = vmatpush.xpose.msra.mxu2 %v416_v2 }
 0x13a   :  { %778 = vmatpush.xpose.msra.mxu3 %v417_v3  ;;  %740 = vmatpush.xpose.msra.mxu1 %v407_v4  ;;  %v804_v4 = vld [vmem:[%s1496_s5 + $0x60] sm:$0xff] }
 0x13b   :  { %720 = vmatpush.xpose.msra.mxu0 %v406_v5 }
 0x13d   :  { %759 = vmatpush.xpose.msra.mxu2 %v412_v6  ;;  %v810_v6 = vld [vmem:[%s1496_s5 + $0x90] sm:$0xff] }
 0x13e   :  { %779 = vmatpush.xpose.msra.mxu3 %v413_v7  ;;  %741 = vmatpush.xpose.msra.mxu1 %v403_v10  ;;  %v801_v7 = vld [vmem:[%s1496_s5 + $0x48] sm:$0xff] }
 0x13f   :  { %721 = vmatpush.xpose.msra.mxu0 %v402_v11 }
 0x141   :  { %760 = vmatpush.xpose.msra.mxu2 %v408_v12 }
 0x142   :  { %780 = vmatpush.xpose.msra.mxu3 %v409_v13  ;;  %742 = vmatpush.xpose.msra.mxu1 %v399_v14  ;;  %v800_v13 = vld [vmem:[%s1496_s5 + $0x40] sm:$0xff]  ;;  %v806_v14 = vld [vmem:[%s1496_s5 + $0x70] sm:$0xff] }
 0x143   :  { %722 = vmatpush.xpose.msra.mxu0 %v398_v15  ;;  %v855_v15 = vld [vmem:[%s1496_s5 + $0x1f8] sm:$0xff] }
 0x145   :  { %761 = vmatpush.xpose.msra.mxu2 %v404_v16  ;;  %v485_v49 = vpop.f32.mrf.mxu0 }
 0x146   :  { %781 = vmatpush.xpose.msra.mxu3 %v405_v17  ;;  %743 = vmatpush.xpose.msra.mxu1 %v395_v18  ;;  %v505_v53 = vpop.f32.mrf.mxu1  ;;  %v486_v2 = vadd.f32 %v485_v49, %v460_v59  ;;  %v797_v17 = vld [vmem:[%s1496_s5 + $0x28] sm:$0xff]  ;;  %v851_v18 = vld [vmem:[%s1496_s5 + $0x1d8] sm:$0xff] }
 0x147   :  { %723 = vmatpush.xpose.msra.mxu0 %v394_v22  ;;  %v796_v22 = vld [vmem:[%s1496_s5 + $0x20] sm:$0xff]  ;;  %v807_v49 = vld [vmem:[%s1496_s5 + $0x78] sm:$0xff] }
 0x148   :  { %v506_v11 = vadd.f32 %v505_v53, %v486_v2  ;;  %v463_v53 = vperm.slane %v1380_v55, 3 }
 0x149   :  { %762 = vmatpush.xpose.msra.mxu2 %v400_v24  ;;  %744 = vmatmul.f32.vlgmr.msra.gmra.mxu1 %v1262_v9  ;;  %v844_v9 = vld [vmem:[%s1496_s5 + $0x1a0] sm:$0xff]  ;;  %v802_v24 = vld [vmem:[%s1496_s5 + $0x50] sm:$0xff] }
 0x14a   :  { %880 = vmatpush.xpose.msrb.mxu1 %v853_v19  ;;  %782 = vmatpush.xpose.msra.mxu3 %v401_v25 }
 0x14b   :  { %860 = vmatpush.xpose.msrb.mxu0 %v852_v23 }
 0x14c   :  { %724 = vmatmul.f32.vlgmr.msra.gmra.mxu0 %v1260_v8  ;;  %v850_v8 = vld [vmem:[%s1496_s5 + $0x1d0] sm:$0xff] }
 0x14d   :  { %763 = vmatpush.xpose.msra.mxu2 %v396_v28  ;;  %v565_v62 = vpop.f32.mrf.mxu0 }
 0x14e   :  { %881 = vmatpush.xpose.msrb.mxu1 %v849_v26  ;;  %783 = vmatpush.xpose.msra.mxu3 %v397_v29  ;;  %v566_v3 = vadd.f32 %v565_v62, %v461_v60  ;;  %v793_v26 = vld [vmem:[%s1496_s5 + $0x8] sm:$0xff]  ;;  %v792_v29 = vld [vmem:[%s1496_s5] sm:$0xff] }
 0x14f   :  { %861 = vmatpush.xpose.msrb.mxu0 %v848_v27  ;;  %v847_v27 = vld [vmem:[%s1496_s5 + $0x1b8] sm:$0xff] }
 0x150   :  { %764 = vmatmul.f32.vlgmr.msra.gmra.mxu2 %v1266_v20  ;;  %v837_v20 = vld [vmem:[%s1496_s5 + $0x168] sm:$0xff]  ;;  %v585_v5 = vpop.f32.mrf.mxu1 }
 0x151   :  { %900 = vmatpush.xpose.msrb.mxu2 %v854_v30  ;;  %784 = vmatmul.f32.vlgmr.msra.gmra.mxu3 %v1268_v21  ;;  %v836_v21 = vld [vmem:[%s1496_s5 + $0x160] sm:$0xff]  ;;  %v586_v12 = vadd.f32 %v585_v5, %v566_v3  ;;  %v798_v30 = vld [vmem:[%s1496_s5 + $0x30] sm:$0xff] }
 0x152   :  { %882 = vmatpush.xpose.msrb.mxu1 %v845_v31  ;;  %920 = vmatpush.xpose.msrb.mxu3 %v855_v15 }
 0x153   :  { %862 = vmatpush.xpose.msrb.mxu0 %v844_v9  ;;  %v525_v56 = vpop.f32.mrf.mxu2  ;;  %v843_v9 = vld [vmem:[%s1496_s5 + $0x198] sm:$0xff] }
 0x154   :  { %v545_v1 = vpop.f32.mrf.mxu3  ;;  %v526_v19 = vadd.f32 %v525_v56, %v506_v11 }
 0x155   :  { %901 = vmatpush.xpose.msrb.mxu2 %v850_v8 }
 0x156   :  { %883 = vmatpush.xpose.msrb.mxu1 %v841_v32  ;;  %921 = vmatpush.xpose.msrb.mxu3 %v851_v18  ;;  %v546_v28 = vadd.f32 %v545_v1, %v526_v19  ;;  %v794_v32 = vld [vmem:[%s1496_s5 + $0x10] sm:$0xff] }
 0x157   :  { %863 = vmatpush.xpose.msrb.mxu0 %v840_v33  ;;  %v839_v33 = vld [vmem:[%s1496_s5 + $0x178] sm:$0xff] }
 0x158   :  { %v788_v8 = vmax.f32 %v546_v28, 0.0 }
 0x159   :  { %902 = vmatpush.xpose.msrb.mxu2 %v846_v34  ;;  %v462_v34 = vperm.slane %v1380_v55, 2 }
 0x15a   :  { %884 = vmatpush.xpose.msrb.mxu1 %v837_v20  ;;  %922 = vmatpush.xpose.msrb.mxu3 %v847_v27  ;;  %v835_v20 = vld [vmem:[%s1496_s5 + $0x158] sm:$0xff] }
 0x15b   :  { %864 = vmatpush.xpose.msrb.mxu0 %v836_v21  ;;  %v605_v10 = vpop.f32.mrf.mxu2 }
 0x15c   :  { %v606_v16 = vadd.f32 %v605_v10, %v586_v12  ;;  %v625_v23 = vpop.f32.mrf.mxu3 }
 0x15d   :  { %903 = vmatpush.xpose.msrb.mxu2 %v842_v35 }
 0x15e   :  { %885 = vmatpush.xpose.msrb.mxu1 %v833_v36  ;;  %v626_v25 = vadd.f32 %v625_v23, %v606_v16  ;;  %923 = vmatpush.xpose.msrb.mxu3 %v843_v9  ;;  %v831_v36 = vld [vmem:[%s1496_s5 + $0x138] sm:$0xff] }
 0x15f   :  { %865 = vmatpush.xpose.msrb.mxu0 %v832_v37 }
 0x160   :  { %v789_v31 = vmax.f32 %v626_v25, 0.0 }
 0x161   :  { %904 = vmatpush.xpose.msrb.mxu2 %v838_v38 }
 0x162   :  { %886 = vmatpush.xpose.msrb.mxu1 %v829_v39  ;;  %924 = vmatpush.xpose.msrb.mxu3 %v839_v33  ;;  %v827_v39 = vld [vmem:[%s1496_s5 + $0x118] sm:$0xff] }
 0x163   :  { %866 = vmatpush.xpose.msrb.mxu0 %v828_v40 }
 0x165   :  { %905 = vmatpush.xpose.msrb.mxu2 %v834_v41 }
 0x166   :  { %887 = vmatpush.xpose.msrb.mxu1 %v825_v42  ;;  %925 = vmatpush.xpose.msrb.mxu3 %v835_v20 }
 0x167   :  { %867 = vmatpush.xpose.msrb.mxu0 %v824_v43 }
 0x169   :  { %906 = vmatpush.xpose.msrb.mxu2 %v830_v44  ;;  %v823_v44 = vld [vmem:[%s1496_s5 + $0xf8] sm:$0xff] }
 0x16a   :  { %888 = vmatpush.xpose.msrb.mxu1 %v821_v45  ;;  %926 = vmatpush.xpose.msrb.mxu3 %v831_v36 }
 0x16b   :  { %868 = vmatpush.xpose.msrb.mxu0 %v820_v46  ;;  %v819_v46 = vld [vmem:[%s1496_s5 + $0xd8] sm:$0xff] }
 0x16d   :  { %907 = vmatpush.xpose.msrb.mxu2 %v826_v47  ;;  %v815_v47 = vld [vmem:[%s1496_s5 + $0xb8] sm:$0xff] }
 0x16e   :  { %889 = vmatpush.xpose.msrb.mxu1 %v817_v48  ;;  %927 = vmatpush.xpose.msrb.mxu3 %v827_v39  ;;  %v811_v48 = vld [vmem:[%s1496_s5 + $0x98] sm:$0xff] }
 0x16f   :  { %869 = vmatpush.xpose.msrb.mxu0 %v816_v50  ;;  %v803_v50 = vld [vmem:[%s1496_s5 + $0x58] sm:$0xff] }
 0x171   :  { %908 = vmatpush.xpose.msrb.mxu2 %v822_v51  ;;  %v799_v51 = vld [vmem:[%s1496_s5 + $0x38] sm:$0xff] }
 0x172   :  { %890 = vmatpush.xpose.msrb.mxu1 %v813_v52  ;;  %928 = vmatpush.xpose.msrb.mxu3 %v823_v44  ;;  %v795_v52 = vld [vmem:[%s1496_s5 + $0x18] sm:$0xff]  ;;  %s1018_s5 = smov [#allocation5]  }
 0x173   :  { %870 = vmatpush.xpose.msrb.mxu0 %v812_v54  ;;  %s946_s3 = sshll.u32 %s1018_s5, 4  ;;  %s947_s3 = int_to_ptr.vmem [resolvable:$true] %s946_s3 }
 0x175   :  { %909 = vmatpush.xpose.msrb.mxu2 %v818_v57 }
 0x176   :  { %891 = vmatpush.xpose.msrb.mxu1 %v809_v58  ;;  %929 = vmatpush.xpose.msrb.mxu3 %v819_v46 }
 0x177   :  { %871 = vmatpush.xpose.msrb.mxu0 %v808_v61 }
 0x179   :  { %910 = vmatpush.xpose.msrb.mxu2 %v814_v63 }
 0x17a   :  { %892 = vmatpush.xpose.msrb.mxu1 %v805_v0  ;;  %930 = vmatpush.xpose.msrb.mxu3 %v815_v47  ;;  %v962_v0 = vld [vmem:[%s1497_s6] ss:$0 sm:$0xff] }
 0x17b   :  { %872 = vmatpush.xpose.msrb.mxu0 %v804_v4 }
 0x17d   :  { %911 = vmatpush.xpose.msrb.mxu2 %v810_v6 }
 0x17e   :  { %893 = vmatpush.xpose.msrb.mxu1 %v801_v7  ;;  %931 = vmatpush.xpose.msrb.mxu3 %v811_v48 }
 0x17f   :  { %873 = vmatpush.xpose.msrb.mxu0 %v800_v13 }
 0x181   :  { %912 = vmatpush.xpose.msrb.mxu2 %v806_v14 }
 0x182   :  { %894 = vmatpush.xpose.msrb.mxu1 %v797_v17  ;;  %932 = vmatpush.xpose.msrb.mxu3 %v807_v49 }
 0x183   :  { %874 = vmatpush.xpose.msrb.mxu0 %v796_v22 }
 0x185   :  { %913 = vmatpush.xpose.msrb.mxu2 %v802_v24 }
 0x186   :  { %895 = vmatpush.xpose.msrb.mxu1 %v793_v26  ;;  %v665_v37 = vpop.f32.mrf.mxu1  ;;  %933 = vmatpush.xpose.msrb.mxu3 %v803_v50 }
 0x187   :  { %875 = vmatpush.xpose.msrb.mxu0 %v792_v29 }
 0x189   :  { %896 = vmatmul.f32.vlgmr.msrb.gmra.mxu1 %v789_v31  ;;  %914 = vmatpush.xpose.msrb.mxu2 %v798_v30  ;;  %v645_v21 = vpop.f32.mrf.mxu0 }
 0x18a   :  { %876 = vmatmul.f32.vlgmr.msrb.gmra.mxu0 %v788_v8  ;;  %v646_v35 = vadd.f32 %v645_v21, %v462_v34  ;;  %934 = vmatpush.xpose.msrb.mxu3 %v799_v51 }
 0x18c   :  { %v666_v38 = vadd.f32 %v665_v37, %v646_v35 }
 0x18d   :  { %915 = vmatpush.xpose.msrb.mxu2 %v794_v32 }
 0x18e   :  { %935 = vmatpush.xpose.msrb.mxu3 %v795_v52 }
 0x193   :  { %v685_v40 = vpop.f32.mrf.mxu2 }
 0x194   :  { %v686_v41 = vadd.f32 %v685_v40, %v666_v38  ;;  %v705_v42 = vpop.f32.mrf.mxu3 }
 0x196   :  { %v706_v43 = vadd.f32 %v705_v42, %v686_v41 }
 0x198   :  { %v790_v45 = vmax.f32 %v706_v43, 0.0 }
 0x19a   :  { %916 = vmatmul.f32.vlgmr.msrb.gmra.mxu2 %v790_v45 }
 0x1c6   :  { %v745_v57 = vpop.f32.mrf.mxu1 }
 0x1c9   :  { %v725_v54 = vpop.f32.mrf.mxu0 }
 0x1ca   :  { %v726_v56 = vadd.f32 %v725_v54, %v463_v53 }
 0x1cc   :  { %v746_v58 = vadd.f32 %v745_v57, %v726_v56 }
 0x1d3   :  { %v765_v59 = vpop.f32.mrf.mxu2 }
 0x1d4   :  { %v766_v60 = vadd.f32 %v765_v59, %v746_v58  ;;  %v785_v61 = vpop.f32.mrf.mxu3 }
 0x1d6   :  { %v786_v62 = vadd.f32 %v785_v61, %v766_v60 }
 0x1d8   :  { %v791_v63 = vmax.f32 %v786_v62, 0.0 }
 0x1da   :  { %936 = vmatmul.f32.vlgmr.msrb.gmra.mxu3 %v791_v63 }
 0x206   :  { %v897_v3 = vpop.f32.mrf.mxu1 }
 0x207   :  { %v877_v1 = vpop.f32.mrf.mxu0 }
 0x208   :  { %v878_v2 = vadd.f32 %v962_v0, %v877_v1 }
 0x20a   :  { %v898_v5 = vadd.f32 %v897_v3, %v878_v2 }
 0x21d   :  { %v917_v4 = vpop.f32.mrf.mxu2 }
 0x21e   :  { %v918_v55 = vadd.f32 %v917_v4, %v898_v5 }
 0x25d   :  { %v937_v6 = vpop.f32.mrf.mxu3 }
 0x25e   :  { %v938_v7 = vadd.f32 %v937_v6, %v918_v55 }
 0x260   :  { %940 = vst [vmem:[#allocation5] sm:$0xff] %v938_v7 }
 0x261   :  { %951 = dma.vmem_to_hbm [thread:$0]  %s947_s3, 128, %s949_s16, [#allocation4]  }
 0x262   :  { %1013 = dma.done.wait [#allocation4], 128  }
 0x263   :  { %1014 = vsyncadd [#allocation4], 4294967168 }
 0x264   :  { %956 = vsyncpa [#allocation3], 1 }
 0x265   :  { %957 = vsyncpa [#allocation4], 1 }

</bundles_post_ra>
